<compile_context>
chip_gen: v7x
topology: tpu7x:2x2x1
jax: 0.10.0
libtpu: 0.0.40
codegen_flags: <defaults>
</compile_context>

<pallas_src>
import functools

import jax
import jax.numpy as jnp
import numpy as np
from jax import lax
from jax.experimental import pallas as pl
from jax.experimental.pallas import tpu as pltpu


def _fused_cnn_kernel(x_ref, w_ref, b_ref, o_ref, act_ref, patch_ref, *,
                      H, W, KH, KW, cout, cpad, pad_left, x_row, layer_plan):
    """Fused CNN forward for one sample (all layers, ONE matmul per layer).

    x_ref     (C0, H*W)                input sample, flattened spatial
    w_ref     (L, Cout, KH*KW*cpad)    im2col-packed weights (cin zero-padded to
                                       cpad, cin permuted to act-row order)
    b_ref     (L, Cout, 1)             biases
    o_ref     (Cout, H*W)              output sample
    act_ref   (cpad, pad_left+H*W+pad_right)  activation scratch, zero halos
    patch_ref (KH*KW*cpad, H*W)        im2col patch scratch
    """
    HW = H * W
    ph, pw = KH // 2, KW // 2
    width = act_ref.shape[1]

    # Zero only the halo lanes (vertical 'same' padding) -- interior rows are
    # always written before being read.  Zero the whole patch once: rows for
    # channels >= cin stay 0 and the matching packed-weight columns are 0.
    if pad_left > 0:
        act_ref[:, 0:pad_left] = jnp.zeros((cpad, pad_left), jnp.float32)
    if width - pad_left - HW > 0:
        act_ref[:, pad_left + HW:] = jnp.zeros(
            (cpad, width - pad_left - HW), jnp.float32)
    patch_ref[...] = jnp.zeros_like(patch_ref)

    # Horizontal row-wrap masks, built in-kernel (no extra input DMA).
    col = lax.broadcasted_iota(jnp.int32, (1, HW), 1) % W
    masks = {kw: ((col + (kw - pw) >= 0) & (col + (kw - pw) < W)
                  ).astype(jnp.float32)
             for kw in range(KW) if kw != pw}

    # The input sample doubles as the first skip connection; park it in slot 1.
    c0 = layer_plan[0][1]
    act_ref[x_row:x_row + c0, pad_left:pad_left + HW] = \
        x_ref[...].astype(jnp.float32)

    out = None
    for i, (r0, cin, out_row) in enumerate(layer_plan):
        # im2col: write the KH*KW shifted (+wrap-masked) windows into the patch.
        for kh in range(KH):
            for kw in range(KW):
                t = kh * KW + kw
                off = pad_left + (kh - ph) * W + (kw - pw)
                win = act_ref[r0:r0 + cin, off:off + HW]        # (cin, HW)
                if kw != pw:
                    win = win * masks[kw]                       # fold wrap mask
                patch_ref[t * cpad:t * cpad + cin, :] = win
        # ONE MXU matmul per layer: (Cout, K) @ (K, HW), K = KH*KW*cpad.
        acc = jnp.dot(w_ref[i], patch_ref[...],
                      preferred_element_type=jnp.float32)       # (Cout, HW)
        out = jnp.maximum(acc + b_ref[i], 0.0)
        if out_row is not None:   # ping-pong slot: next layer reads it in place
            act_ref[out_row:out_row + cout, pad_left:pad_left + HW] = out

    o_ref[...] = out.astype(o_ref.dtype)


def cnn_forward(x_nchw, params):
    """Forward pass identical to CNN.forward (skip-connection concat chain)."""
    N, C0, H, W = x_nchw.shape
    KH, KW, _, Cout = params[0][0].shape
    n_layers = len(params)
    HW = H * W
    ph, pw = KH // 2, KW // 2

    # ---- static layout plan: ping-pong output slots, x parked in slot 1 ----
    # slot0 = act rows [0:Cout), slot1 = act rows [Cout:...); x lives in slot1.
    if n_layers == 1:
        cpad, x_row = C0, 0
        layer_plan = ((0, C0, None),)
    else:
        cpad = Cout + max(C0, Cout)
        x_row = Cout
        plan = []
        for i, (w, _) in enumerate(params):
            cin = int(w.shape[2])
            r0 = x_row if i == 0 else 0
            out_row = None if i == n_layers - 1 else (0 if i % 2 == 0 else Cout)
            plan.append((r0, cin, out_row))
        layer_plan = tuple(plan)

    halo = ph * W + pw
    pad_left = ((halo + 127) // 128) * 128 if halo > 0 else 0
    pad_right = pad_left
    K = KH * KW * cpad

    # ---- pack ALL weights/biases into single buffers (im2col layout) -------
    wks, bks = [], []
    for i, (w, b) in enumerate(params):
        cin = int(w.shape[2])
        if n_layers > 1 and i >= 2 and i % 2 == 0:
            # ping-pong: the two Cout-channel groups sit swapped in act rows.
            w = jnp.concatenate([w[:, :, Cout:, :], w[:, :, :Cout, :]], axis=2)
        # HWIO (kh,kw,cin,cout) -> (cout, kh*kw, cin), zero-pad cin -> cpad.
        wt = jnp.transpose(w, (3, 0, 1, 2)).reshape(Cout, KH * KW, cin)
        wp = jnp.zeros((Cout, KH * KW, cpad), jnp.float32).at[:, :, :cin].set(wt)
        wks.append(wp.reshape(Cout, K))
        bks.append(b.reshape(Cout, 1).astype(jnp.float32))
    w_packed = jnp.stack(wks)          # (L, Cout, K)  -- one DMA
    b_packed = jnp.stack(bks)          # (L, Cout, 1)  -- one DMA

    x_flat = x_nchw.reshape(N, C0, HW)

    kernel = functools.partial(
        _fused_cnn_kernel, H=H, W=W, KH=KH, KW=KW, cout=Cout, cpad=cpad,
        pad_left=pad_left, x_row=x_row, layer_plan=layer_plan)

    flops = sum(2 * N * HW * KH * KW * int(w.shape[2]) * Cout
                for (w, _) in params)
    bytes_accessed = 4 * (x_flat.size + N * Cout * HW
                          + w_packed.size + b_packed.size)

    out_flat = pl.pallas_call(
        kernel,
        out_shape=jax.ShapeDtypeStruct((N, Cout, HW), x_nchw.dtype),
        grid_spec=pltpu.PrefetchScalarGridSpec(
            num_scalar_prefetch=0,
            grid=(N,),
            in_specs=[
                pl.BlockSpec((None, C0, HW), lambda n: (n, 0, 0)),
                pl.BlockSpec((n_layers, Cout, K), lambda n: (0, 0, 0)),
                pl.BlockSpec((n_layers, Cout, 1), lambda n: (0, 0, 0)),
            ],
            out_specs=pl.BlockSpec((None, Cout, HW), lambda n: (n, 0, 0)),
            scratch_shapes=[
                pltpu.VMEM((cpad, pad_left + HW + pad_right), jnp.float32),
                pltpu.VMEM((K, HW), jnp.float32),
            ],
        ),
        compiler_params=pltpu.CompilerParams(
            dimension_semantics=("parallel",)),
        cost_estimate=pl.CostEstimate(
            flops=flops, transcendentals=0, bytes_accessed=bytes_accessed),
    )(x_flat, w_packed, b_packed)
    return out_flat.reshape(N, Cout, H, W)


def init_cnn_params(key, n_input_channels, n_conv_layers, n_kernels, kernel_size):
    """Deterministic parameter init mirroring the module's __init__ shapes."""
    params = []
    n_concat_channels = n_input_channels
    for _ in range(n_conv_layers):
        key, kw_key, kb_key = jax.random.split(key, 3)
        fan_in = n_concat_channels * kernel_size * kernel_size
        bound = 1.0 / np.sqrt(fan_in)
        # HWIO layout: (kh, kw, cin, cout)
        w = jax.random.uniform(
            kw_key, (kernel_size, kernel_size, n_concat_channels, n_kernels),
            minval=-bound, maxval=bound, dtype=jnp.float32)
        b = jax.random.uniform(
            kb_key, (n_kernels,), minval=-bound, maxval=bound, dtype=jnp.float32)
        params.append((w, b))
        n_concat_channels = n_kernels + n_input_channels
        n_input_channels = n_kernels
    return params


def _reference_forward(x_nchw, params):
    """Pure-JAX reference (lax conv) for correctness check."""
    x = x_nchw
    skip = None
    out = None
    for (w, b) in params:
        if skip is not None:
            inp = jnp.concatenate([out, skip], axis=1)
            skip = out
        else:
            inp = x
            skip = x
        k = w.shape[0]
        y = jax.lax.conv_general_dilated(
            inp, w, window_strides=(1, 1),
            padding=[(k // 2, k // 2), (k // 2, k // 2)],
            dimension_numbers=("NCHW", "HWIO", "NCHW"))
        out = jnp.maximum(y + b[None, :, None, None], 0.0)
    return out


if __name__ == "__main__":
    # Small shapes consistent with the module: batch=2, channels=4, 16x16.
    n_input_channels, n_conv_layers, n_kernels, kernel_size = 4, 3, 8, 3
    key = jax.random.PRNGKey(0)
    key, xkey = jax.random.split(key)
    x = jax.random.normal(xkey, (2, n_input_channels, 16, 16), dtype=jnp.float32)

    params = init_cnn_params(key, n_input_channels, n_conv_layers,
                             n_kernels, kernel_size)

    out = jax.block_until_ready(cnn_forward(x, params))
    ref = jax.block_until_ready(_reference_forward(x, params))

    assert out.shape == (2, n_kernels, 16, 16), out.shape
    np.testing.assert_allclose(np.asarray(out), np.asarray(ref),
                               rtol=1e-4, atol=1e-4)
    print("KERNEL_OK")
</pallas_src>

<mosaic_0001>
module attributes {stable_mosaic.version = 11 : i64} {
  func.func @_fused_cnn_kernel(%arg0: i32, %arg1: memref<1x4x256xf32, #tpu.memory_space<vmem>>, %arg2: memref<3x8x144xf32, #tpu.memory_space<vmem>>, %arg3: memref<3x8x1xf32, #tpu.memory_space<vmem>>, %arg4: memref<1x8x256xf32, #tpu.memory_space<vmem>>, %arg5: memref<16x512xf32, #tpu.memory_space<vmem>>, %arg6: memref<144x256xf32, #tpu.memory_space<vmem>>) attributes {dimension_semantics = [#tpu.dimension_semantics<parallel>], iteration_bounds = array<i64: 2>, scalar_prefetch = 0 : i64, scratch_operands = 2 : i64, tpu.core_type = #tpu.core_type<tc>, window_params = [{transform_indices = @transform_0, window_bounds = array<i64: 1, 4, 256>}, {pipeline_mode = #tpu.pipeline_mode<synchronous>, transform_indices = @transform_1, window_bounds = array<i64: 3, 8, 144>}, {pipeline_mode = #tpu.pipeline_mode<synchronous>, transform_indices = @transform_2, window_bounds = array<i64: 3, 8, 1>}, {transform_indices = @transform_3, window_bounds = array<i64: 1, 8, 256>}]} {
    %cst = arith.constant 0.000000e+00 : f32
    %0 = vector.broadcast %cst : f32 to vector<16x128xf32>
    %c0 = arith.constant 0 : index
    %c0_0 = arith.constant 0 : index
    %1 = vector.load %arg5[%c0, %c0_0] : memref<16x512xf32, #tpu.memory_space<vmem>>, vector<16x128xf32>
    tpu.vector_store %arg5[%c0, %c0_0], %0 {strides = array<i32>} : memref<16x512xf32, #tpu.memory_space<vmem>>, vector<16x128xf32>,
    %cst_1 = arith.constant 0.000000e+00 : f32
    %2 = vector.broadcast %cst_1 : f32 to vector<16x128xf32>
    %c0_2 = arith.constant 0 : index
    %c384 = arith.constant 384 : index
    %3 = vector.load %arg5[%c0_2, %c384] : memref<16x512xf32, #tpu.memory_space<vmem>>, vector<16x128xf32>
    tpu.vector_store %arg5[%c0_2, %c384], %2 {strides = array<i32>} : memref<16x512xf32, #tpu.memory_space<vmem>>, vector<16x128xf32>,
    %cst_3 = arith.constant 0.000000e+00 : f32
    %4 = vector.broadcast %cst_3 : f32 to vector<144x256xf32>
    %c0_4 = arith.constant 0 : index
    %c0_5 = arith.constant 0 : index
    %5 = vector.load %arg6[%c0_4, %c0_5] : memref<144x256xf32, #tpu.memory_space<vmem>>, vector<144x256xf32>
    tpu.vector_store %arg6[%c0_4, %c0_5], %4 {strides = array<i32>} : memref<144x256xf32, #tpu.memory_space<vmem>>, vector<144x256xf32>,
    %6 = tpu.iota {dimensions = array<i32: 1>} : vector<1x256xi32>
    %c16_i32 = arith.constant 16 : i32
    %c0_i32 = arith.constant 0 : i32
    %7 = arith.cmpi eq, %c16_i32, %c0_i32 : i32
    %c1_i32 = arith.constant 1 : i32
    %8 = arith.select %7, %c1_i32, %c16_i32 : i32
    %9 = vector.broadcast %8 : i32 to vector<1x256xi32>
    %10 = arith.remsi %6, %9 : vector<1x256xi32>
    %c0_i32_6 = arith.constant 0 : i32
    %11 = vector.broadcast %c0_i32_6 : i32 to vector<1x256xi32>
    %12 = arith.cmpi ne, %10, %11 : vector<1x256xi32>
    %c0_i32_7 = arith.constant 0 : i32
    %13 = vector.broadcast %c0_i32_7 : i32 to vector<1x256xi32>
    %14 = arith.cmpi slt, %10, %13 : vector<1x256xi32>
    %c0_i32_8 = arith.constant 0 : i32
    %15 = arith.cmpi slt, %8, %c0_i32_8 : i32
    %16 = vector.broadcast %15 : i1 to vector<1x256xi1>
    %17 = vector.broadcast %16 : vector<1x256xi1> to vector<1x256xi1>
    %18 = arith.xori %14, %17 : vector<1x256xi1>
    %19 = arith.andi %18, %12 : vector<1x256xi1>
    %20 = vector.broadcast %8 : i32 to vector<1x256xi32>
    %21 = arith.addi %10, %20 : vector<1x256xi32>
    %22 = arith.select %19, %21, %10 : vector<1x256xi1>, vector<1x256xi32>
    %c-1_i32 = arith.constant -1 : i32
    %23 = vector.broadcast %c-1_i32 : i32 to vector<1x256xi32>
    %24 = arith.addi %22, %23 : vector<1x256xi32>
    %c0_i32_9 = arith.constant 0 : i32
    %25 = vector.broadcast %c0_i32_9 : i32 to vector<1x256xi32>
    %26 = arith.cmpi sge, %24, %25 : vector<1x256xi32>
    %c-1_i32_10 = arith.constant -1 : i32
    %27 = vector.broadcast %c-1_i32_10 : i32 to vector<1x256xi32>
    %28 = arith.addi %22, %27 : vector<1x256xi32>
    %c16_i32_11 = arith.constant 16 : i32
    %29 = vector.broadcast %c16_i32_11 : i32 to vector<1x256xi32>
    %30 = arith.cmpi slt, %28, %29 : vector<1x256xi32>
    %31 = arith.andi %26, %30 : vector<1x256xi1>
    %32 = arith.extui %31 : vector<1x256xi1> to vector<1x256xi32>
    %33 = arith.sitofp %32 : vector<1x256xi32> to vector<1x256xf32>
    %c1_i32_12 = arith.constant 1 : i32
    %34 = vector.broadcast %c1_i32_12 : i32 to vector<1x256xi32>
    %35 = arith.addi %22, %34 : vector<1x256xi32>
    %c0_i32_13 = arith.constant 0 : i32
    %36 = vector.broadcast %c0_i32_13 : i32 to vector<1x256xi32>
    %37 = arith.cmpi sge, %35, %36 : vector<1x256xi32>
    %c1_i32_14 = arith.constant 1 : i32
    %38 = vector.broadcast %c1_i32_14 : i32 to vector<1x256xi32>
    %39 = arith.addi %22, %38 : vector<1x256xi32>
    %c16_i32_15 = arith.constant 16 : i32
    %40 = vector.broadcast %c16_i32_15 : i32 to vector<1x256xi32>
    %41 = arith.cmpi slt, %39, %40 : vector<1x256xi32>
    %42 = arith.andi %37, %41 : vector<1x256xi1>
    %43 = arith.extui %42 : vector<1x256xi1> to vector<1x256xi32>
    %44 = arith.sitofp %43 : vector<1x256xi32> to vector<1x256xf32>
    %c0_16 = arith.constant 0 : index
    %c0_17 = arith.constant 0 : index
    %c0_18 = arith.constant 0 : index
    %45 = vector.load %arg1[%c0_16, %c0_17, %c0_18] : memref<1x4x256xf32, #tpu.memory_space<vmem>>, vector<1x4x256xf32>
    %46 = vector.shape_cast %45 : vector<1x4x256xf32> to vector<4x256xf32>
    %c8 = arith.constant 8 : index
    %c128 = arith.constant 128 : index
    %47 = vector.load %arg5[%c8, %c128] : memref<16x512xf32, #tpu.memory_space<vmem>>, vector<4x256xf32>
    tpu.vector_store %arg5[%c8, %c128], %46 {strides = array<i32>} : memref<16x512xf32, #tpu.memory_space<vmem>>, vector<4x256xf32>,
    %c8_19 = arith.constant 8 : index
    %c111 = arith.constant 111 : index
    %48 = vector.load %arg5[%c8_19, %c111] : memref<16x512xf32, #tpu.memory_space<vmem>>, vector<4x256xf32>
    %49 = vector.broadcast %33 : vector<1x256xf32> to vector<4x256xf32>
    %50 = arith.mulf %48, %49 : vector<4x256xf32>
    %c0_20 = arith.constant 0 : index
    %c0_21 = arith.constant 0 : index
    %51 = vector.load %arg6[%c0_20, %c0_21] : memref<144x256xf32, #tpu.memory_space<vmem>>, vector<4x256xf32>
    tpu.vector_store %arg6[%c0_20, %c0_21], %50 {strides = array<i32>} : memref<144x256xf32, #tpu.memory_space<vmem>>, vector<4x256xf32>,
    %c8_22 = arith.constant 8 : index
    %c112 = arith.constant 112 : index
    %52 = vector.load %arg5[%c8_22, %c112] : memref<16x512xf32, #tpu.memory_space<vmem>>, vector<4x256xf32>
    %c16 = arith.constant 16 : index
    %c0_23 = arith.constant 0 : index
    %53 = vector.load %arg6[%c16, %c0_23] : memref<144x256xf32, #tpu.memory_space<vmem>>, vector<4x256xf32>
    tpu.vector_store %arg6[%c16, %c0_23], %52 {strides = array<i32>} : memref<144x256xf32, #tpu.memory_space<vmem>>, vector<4x256xf32>,
    %c8_24 = arith.constant 8 : index
    %c113 = arith.constant 113 : index
    %54 = vector.load %arg5[%c8_24, %c113] : memref<16x512xf32, #tpu.memory_space<vmem>>, vector<4x256xf32>
    %55 = vector.broadcast %44 : vector<1x256xf32> to vector<4x256xf32>
    %56 = arith.mulf %54, %55 : vector<4x256xf32>
    %c32 = arith.constant 32 : index
    %c0_25 = arith.constant 0 : index
    %57 = vector.load %arg6[%c32, %c0_25] : memref<144x256xf32, #tpu.memory_space<vmem>>, vector<4x256xf32>
    tpu.vector_store %arg6[%c32, %c0_25], %56 {strides = array<i32>} : memref<144x256xf32, #tpu.memory_space<vmem>>, vector<4x256xf32>,
    %c8_26 = arith.constant 8 : index
    %c127 = arith.constant 127 : index
    %58 = vector.load %arg5[%c8_26, %c127] : memref<16x512xf32, #tpu.memory_space<vmem>>, vector<4x256xf32>
    %59 = vector.broadcast %33 : vector<1x256xf32> to vector<4x256xf32>
    %60 = arith.mulf %58, %59 : vector<4x256xf32>
    %c48 = arith.constant 48 : index
    %c0_27 = arith.constant 0 : index
    %61 = vector.load %arg6[%c48, %c0_27] : memref<144x256xf32, #tpu.memory_space<vmem>>, vector<4x256xf32>
    tpu.vector_store %arg6[%c48, %c0_27], %60 {strides = array<i32>} : memref<144x256xf32, #tpu.memory_space<vmem>>, vector<4x256xf32>,
    %c8_28 = arith.constant 8 : index
    %c128_29 = arith.constant 128 : index
    %62 = vector.load %arg5[%c8_28, %c128_29] : memref<16x512xf32, #tpu.memory_space<vmem>>, vector<4x256xf32>
    %c64 = arith.constant 64 : index
    %c0_30 = arith.constant 0 : index
    %63 = vector.load %arg6[%c64, %c0_30] : memref<144x256xf32, #tpu.memory_space<vmem>>, vector<4x256xf32>
    tpu.vector_store %arg6[%c64, %c0_30], %62 {strides = array<i32>} : memref<144x256xf32, #tpu.memory_space<vmem>>, vector<4x256xf32>,
    %c8_31 = arith.constant 8 : index
    %c129 = arith.constant 129 : index
    %64 = vector.load %arg5[%c8_31, %c129] : memref<16x512xf32, #tpu.memory_space<vmem>>, vector<4x256xf32>
    %65 = vector.broadcast %44 : vector<1x256xf32> to vector<4x256xf32>
    %66 = arith.mulf %64, %65 : vector<4x256xf32>
    %c80 = arith.constant 80 : index
    %c0_32 = arith.constant 0 : index
    %67 = vector.load %arg6[%c80, %c0_32] : memref<144x256xf32, #tpu.memory_space<vmem>>, vector<4x256xf32>
    tpu.vector_store %arg6[%c80, %c0_32], %66 {strides = array<i32>} : memref<144x256xf32, #tpu.memory_space<vmem>>, vector<4x256xf32>,
    %c8_33 = arith.constant 8 : index
    %c143 = arith.constant 143 : index
    %68 = vector.load %arg5[%c8_33, %c143] : memref<16x512xf32, #tpu.memory_space<vmem>>, vector<4x256xf32>
    %69 = vector.broadcast %33 : vector<1x256xf32> to vector<4x256xf32>
    %70 = arith.mulf %68, %69 : vector<4x256xf32>
    %c96 = arith.constant 96 : index
    %c0_34 = arith.constant 0 : index
    %71 = vector.load %arg6[%c96, %c0_34] : memref<144x256xf32, #tpu.memory_space<vmem>>, vector<4x256xf32>
    tpu.vector_store %arg6[%c96, %c0_34], %70 {strides = array<i32>} : memref<144x256xf32, #tpu.memory_space<vmem>>, vector<4x256xf32>,
    %c8_35 = arith.constant 8 : index
    %c144 = arith.constant 144 : index
    %72 = vector.load %arg5[%c8_35, %c144] : memref<16x512xf32, #tpu.memory_space<vmem>>, vector<4x256xf32>
    %c112_36 = arith.constant 112 : index
    %c0_37 = arith.constant 0 : index
    %73 = vector.load %arg6[%c112_36, %c0_37] : memref<144x256xf32, #tpu.memory_space<vmem>>, vector<4x256xf32>
    tpu.vector_store %arg6[%c112_36, %c0_37], %72 {strides = array<i32>} : memref<144x256xf32, #tpu.memory_space<vmem>>, vector<4x256xf32>,
    %c8_38 = arith.constant 8 : index
    %c145 = arith.constant 145 : index
    %74 = vector.load %arg5[%c8_38, %c145] : memref<16x512xf32, #tpu.memory_space<vmem>>, vector<4x256xf32>
    %75 = vector.broadcast %44 : vector<1x256xf32> to vector<4x256xf32>
    %76 = arith.mulf %74, %75 : vector<4x256xf32>
    %c128_39 = arith.constant 128 : index
    %c0_40 = arith.constant 0 : index
    %77 = vector.load %arg6[%c128_39, %c0_40] : memref<144x256xf32, #tpu.memory_space<vmem>>, vector<4x256xf32>
    tpu.vector_store %arg6[%c128_39, %c0_40], %76 {strides = array<i32>} : memref<144x256xf32, #tpu.memory_space<vmem>>, vector<4x256xf32>,
    %c0_41 = arith.constant 0 : index
    %c0_42 = arith.constant 0 : index
    %c0_43 = arith.constant 0 : index
    %78 = vector.load %arg2[%c0_41, %c0_42, %c0_43] : memref<3x8x144xf32, #tpu.memory_space<vmem>>, vector<1x8x144xf32>
    %79 = vector.shape_cast %78 : vector<1x8x144xf32> to vector<8x144xf32>
    %c0_44 = arith.constant 0 : index
    %c0_45 = arith.constant 0 : index
    %80 = vector.load %arg6[%c0_44, %c0_45] : memref<144x256xf32, #tpu.memory_space<vmem>>, vector<144x256xf32>
    %cst_46 = arith.constant dense<0.000000e+00> : vector<8x256xf32>
    %81 = tpu.matmul %79, %80, %cst_46 {dimension_numbers = #tpu.dot_dimension_numbers<[1], [0], [0], [1], [0, 0, 1, 1], [], []>} : vector<8x144xf32>, vector<144x256xf32>, vector<8x256xf32> -> vector<8x256xf32>
    %c0_47 = arith.constant 0 : index
    %c0_48 = arith.constant 0 : index
    %c0_49 = arith.constant 0 : index
    %82 = vector.load %arg3[%c0_47, %c0_48, %c0_49] : memref<3x8x1xf32, #tpu.memory_space<vmem>>, vector<1x8x1xf32>
    %83 = vector.shape_cast %82 : vector<1x8x1xf32> to vector<8x1xf32>
    %84 = vector.broadcast %83 : vector<8x1xf32> to vector<8x256xf32>
    %85 = arith.addf %81, %84 : vector<8x256xf32>
    %cst_50 = arith.constant 0.000000e+00 : f32
    %86 = vector.broadcast %cst_50 : f32 to vector<8x256xf32>
    %87 = arith.maximumf %85, %86 : vector<8x256xf32>
    %c0_51 = arith.constant 0 : index
    %c128_52 = arith.constant 128 : index
    %88 = vector.load %arg5[%c0_51, %c128_52] : memref<16x512xf32, #tpu.memory_space<vmem>>, vector<8x256xf32>
    tpu.vector_store %arg5[%c0_51, %c128_52], %87 {strides = array<i32>} : memref<16x512xf32, #tpu.memory_space<vmem>>, vector<8x256xf32>,
    %c0_53 = arith.constant 0 : index
    %c111_54 = arith.constant 111 : index
    %89 = vector.load %arg5[%c0_53, %c111_54] : memref<16x512xf32, #tpu.memory_space<vmem>>, vector<12x256xf32>
    %90 = vector.broadcast %33 : vector<1x256xf32> to vector<12x256xf32>
    %91 = arith.mulf %89, %90 : vector<12x256xf32>
    %c0_55 = arith.constant 0 : index
    %c0_56 = arith.constant 0 : index
    %92 = vector.load %arg6[%c0_55, %c0_56] : memref<144x256xf32, #tpu.memory_space<vmem>>, vector<12x256xf32>
    tpu.vector_store %arg6[%c0_55, %c0_56], %91 {strides = array<i32>} : memref<144x256xf32, #tpu.memory_space<vmem>>, vector<12x256xf32>,
    %c0_57 = arith.constant 0 : index
    %c112_58 = arith.constant 112 : index
    %93 = vector.load %arg5[%c0_57, %c112_58] : memref<16x512xf32, #tpu.memory_space<vmem>>, vector<12x256xf32>
    %c16_59 = arith.constant 16 : index
    %c0_60 = arith.constant 0 : index
    %94 = vector.load %arg6[%c16_59, %c0_60] : memref<144x256xf32, #tpu.memory_space<vmem>>, vector<12x256xf32>
    tpu.vector_store %arg6[%c16_59, %c0_60], %93 {strides = array<i32>} : memref<144x256xf32, #tpu.memory_space<vmem>>, vector<12x256xf32>,
    %c0_61 = arith.constant 0 : index
    %c113_62 = arith.constant 113 : index
    %95 = vector.load %arg5[%c0_61, %c113_62] : memref<16x512xf32, #tpu.memory_space<vmem>>, vector<12x256xf32>
    %96 = vector.broadcast %44 : vector<1x256xf32> to vector<12x256xf32>
    %97 = arith.mulf %95, %96 : vector<12x256xf32>
    %c32_63 = arith.constant 32 : index
    %c0_64 = arith.constant 0 : index
    %98 = vector.load %arg6[%c32_63, %c0_64] : memref<144x256xf32, #tpu.memory_space<vmem>>, vector<12x256xf32>
    tpu.vector_store %arg6[%c32_63, %c0_64], %97 {strides = array<i32>} : memref<144x256xf32, #tpu.memory_space<vmem>>, vector<12x256xf32>,
    %c0_65 = arith.constant 0 : index
    %c127_66 = arith.constant 127 : index
    %99 = vector.load %arg5[%c0_65, %c127_66] : memref<16x512xf32, #tpu.memory_space<vmem>>, vector<12x256xf32>
    %100 = vector.broadcast %33 : vector<1x256xf32> to vector<12x256xf32>
    %101 = arith.mulf %99, %100 : vector<12x256xf32>
    %c48_67 = arith.constant 48 : index
    %c0_68 = arith.constant 0 : index
    %102 = vector.load %arg6[%c48_67, %c0_68] : memref<144x256xf32, #tpu.memory_space<vmem>>, vector<12x256xf32>
    tpu.vector_store %arg6[%c48_67, %c0_68], %101 {strides = array<i32>} : memref<144x256xf32, #tpu.memory_space<vmem>>, vector<12x256xf32>,
    %c0_69 = arith.constant 0 : index
    %c128_70 = arith.constant 128 : index
    %103 = vector.load %arg5[%c0_69, %c128_70] : memref<16x512xf32, #tpu.memory_space<vmem>>, vector<12x256xf32>
    %c64_71 = arith.constant 64 : index
    %c0_72 = arith.constant 0 : index
    %104 = vector.load %arg6[%c64_71, %c0_72] : memref<144x256xf32, #tpu.memory_space<vmem>>, vector<12x256xf32>
    tpu.vector_store %arg6[%c64_71, %c0_72], %103 {strides = array<i32>} : memref<144x256xf32, #tpu.memory_space<vmem>>, vector<12x256xf32>,
    %c0_73 = arith.constant 0 : index
    %c129_74 = arith.constant 129 : index
    %105 = vector.load %arg5[%c0_73, %c129_74] : memref<16x512xf32, #tpu.memory_space<vmem>>, vector<12x256xf32>
    %106 = vector.broadcast %44 : vector<1x256xf32> to vector<12x256xf32>
    %107 = arith.mulf %105, %106 : vector<12x256xf32>
    %c80_75 = arith.constant 80 : index
    %c0_76 = arith.constant 0 : index
    %108 = vector.load %arg6[%c80_75, %c0_76] : memref<144x256xf32, #tpu.memory_space<vmem>>, vector<12x256xf32>
    tpu.vector_store %arg6[%c80_75, %c0_76], %107 {strides = array<i32>} : memref<144x256xf32, #tpu.memory_space<vmem>>, vector<12x256xf32>,
    %c0_77 = arith.constant 0 : index
    %c143_78 = arith.constant 143 : index
    %109 = vector.load %arg5[%c0_77, %c143_78] : memref<16x512xf32, #tpu.memory_space<vmem>>, vector<12x256xf32>
    %110 = vector.broadcast %33 : vector<1x256xf32> to vector<12x256xf32>
    %111 = arith.mulf %109, %110 : vector<12x256xf32>
    %c96_79 = arith.constant 96 : index
    %c0_80 = arith.constant 0 : index
    %112 = vector.load %arg6[%c96_79, %c0_80] : memref<144x256xf32, #tpu.memory_space<vmem>>, vector<12x256xf32>
    tpu.vector_store %arg6[%c96_79, %c0_80], %111 {strides = array<i32>} : memref<144x256xf32, #tpu.memory_space<vmem>>, vector<12x256xf32>,
    %c0_81 = arith.constant 0 : index
    %c144_82 = arith.constant 144 : index
    %113 = vector.load %arg5[%c0_81, %c144_82] : memref<16x512xf32, #tpu.memory_space<vmem>>, vector<12x256xf32>
    %c112_83 = arith.constant 112 : index
    %c0_84 = arith.constant 0 : index
    %114 = vector.load %arg6[%c112_83, %c0_84] : memref<144x256xf32, #tpu.memory_space<vmem>>, vector<12x256xf32>
    tpu.vector_store %arg6[%c112_83, %c0_84], %113 {strides = array<i32>} : memref<144x256xf32, #tpu.memory_space<vmem>>, vector<12x256xf32>,
    %c0_85 = arith.constant 0 : index
    %c145_86 = arith.constant 145 : index
    %115 = vector.load %arg5[%c0_85, %c145_86] : memref<16x512xf32, #tpu.memory_space<vmem>>, vector<12x256xf32>
    %116 = vector.broadcast %44 : vector<1x256xf32> to vector<12x256xf32>
    %117 = arith.mulf %115, %116 : vector<12x256xf32>
    %c128_87 = arith.constant 128 : index
    %c0_88 = arith.constant 0 : index
    %118 = vector.load %arg6[%c128_87, %c0_88] : memref<144x256xf32, #tpu.memory_space<vmem>>, vector<12x256xf32>
    tpu.vector_store %arg6[%c128_87, %c0_88], %117 {strides = array<i32>} : memref<144x256xf32, #tpu.memory_space<vmem>>, vector<12x256xf32>,
    %c1 = arith.constant 1 : index
    %c0_89 = arith.constant 0 : index
    %c0_90 = arith.constant 0 : index
    %119 = vector.load %arg2[%c1, %c0_89, %c0_90] : memref<3x8x144xf32, #tpu.memory_space<vmem>>, vector<1x8x144xf32>
    %120 = vector.shape_cast %119 : vector<1x8x144xf32> to vector<8x144xf32>
    %c0_91 = arith.constant 0 : index
    %c0_92 = arith.constant 0 : index
    %121 = vector.load %arg6[%c0_91, %c0_92] : memref<144x256xf32, #tpu.memory_space<vmem>>, vector<144x256xf32>
    %cst_93 = arith.constant dense<0.000000e+00> : vector<8x256xf32>
    %122 = tpu.matmul %120, %121, %cst_93 {dimension_numbers = #tpu.dot_dimension_numbers<[1], [0], [0], [1], [0, 0, 1, 1], [], []>} : vector<8x144xf32>, vector<144x256xf32>, vector<8x256xf32> -> vector<8x256xf32>
    %c1_94 = arith.constant 1 : index
    %c0_95 = arith.constant 0 : index
    %c0_96 = arith.constant 0 : index
    %123 = vector.load %arg3[%c1_94, %c0_95, %c0_96] : memref<3x8x1xf32, #tpu.memory_space<vmem>>, vector<1x8x1xf32>
    %124 = vector.shape_cast %123 : vector<1x8x1xf32> to vector<8x1xf32>
    %125 = vector.broadcast %124 : vector<8x1xf32> to vector<8x256xf32>
    %126 = arith.addf %122, %125 : vector<8x256xf32>
    %cst_97 = arith.constant 0.000000e+00 : f32
    %127 = vector.broadcast %cst_97 : f32 to vector<8x256xf32>
    %128 = arith.maximumf %126, %127 : vector<8x256xf32>
    %c8_98 = arith.constant 8 : index
    %c128_99 = arith.constant 128 : index
    %129 = vector.load %arg5[%c8_98, %c128_99] : memref<16x512xf32, #tpu.memory_space<vmem>>, vector<8x256xf32>
    tpu.vector_store %arg5[%c8_98, %c128_99], %128 {strides = array<i32>} : memref<16x512xf32, #tpu.memory_space<vmem>>, vector<8x256xf32>,
    %c0_100 = arith.constant 0 : index
    %c111_101 = arith.constant 111 : index
    %130 = vector.load %arg5[%c0_100, %c111_101] : memref<16x512xf32, #tpu.memory_space<vmem>>, vector<16x256xf32>
    %131 = vector.broadcast %33 : vector<1x256xf32> to vector<16x256xf32>
    %132 = arith.mulf %130, %131 : vector<16x256xf32>
    %c0_102 = arith.constant 0 : index
    %c0_103 = arith.constant 0 : index
    %133 = vector.load %arg6[%c0_102, %c0_103] : memref<144x256xf32, #tpu.memory_space<vmem>>, vector<16x256xf32>
    tpu.vector_store %arg6[%c0_102, %c0_103], %132 {strides = array<i32>} : memref<144x256xf32, #tpu.memory_space<vmem>>, vector<16x256xf32>,
    %c0_104 = arith.constant 0 : index
    %c112_105 = arith.constant 112 : index
    %134 = vector.load %arg5[%c0_104, %c112_105] : memref<16x512xf32, #tpu.memory_space<vmem>>, vector<16x256xf32>
    %c16_106 = arith.constant 16 : index
    %c0_107 = arith.constant 0 : index
    %135 = vector.load %arg6[%c16_106, %c0_107] : memref<144x256xf32, #tpu.memory_space<vmem>>, vector<16x256xf32>
    tpu.vector_store %arg6[%c16_106, %c0_107], %134 {strides = array<i32>} : memref<144x256xf32, #tpu.memory_space<vmem>>, vector<16x256xf32>,
    %c0_108 = arith.constant 0 : index
    %c113_109 = arith.constant 113 : index
    %136 = vector.load %arg5[%c0_108, %c113_109] : memref<16x512xf32, #tpu.memory_space<vmem>>, vector<16x256xf32>
    %137 = vector.broadcast %44 : vector<1x256xf32> to vector<16x256xf32>
    %138 = arith.mulf %136, %137 : vector<16x256xf32>
    %c32_110 = arith.constant 32 : index
    %c0_111 = arith.constant 0 : index
    %139 = vector.load %arg6[%c32_110, %c0_111] : memref<144x256xf32, #tpu.memory_space<vmem>>, vector<16x256xf32>
    tpu.vector_store %arg6[%c32_110, %c0_111], %138 {strides = array<i32>} : memref<144x256xf32, #tpu.memory_space<vmem>>, vector<16x256xf32>,
    %c0_112 = arith.constant 0 : index
    %c127_113 = arith.constant 127 : index
    %140 = vector.load %arg5[%c0_112, %c127_113] : memref<16x512xf32, #tpu.memory_space<vmem>>, vector<16x256xf32>
    %141 = vector.broadcast %33 : vector<1x256xf32> to vector<16x256xf32>
    %142 = arith.mulf %140, %141 : vector<16x256xf32>
    %c48_114 = arith.constant 48 : index
    %c0_115 = arith.constant 0 : index
    %143 = vector.load %arg6[%c48_114, %c0_115] : memref<144x256xf32, #tpu.memory_space<vmem>>, vector<16x256xf32>
    tpu.vector_store %arg6[%c48_114, %c0_115], %142 {strides = array<i32>} : memref<144x256xf32, #tpu.memory_space<vmem>>, vector<16x256xf32>,
    %c0_116 = arith.constant 0 : index
    %c128_117 = arith.constant 128 : index
    %144 = vector.load %arg5[%c0_116, %c128_117] : memref<16x512xf32, #tpu.memory_space<vmem>>, vector<16x256xf32>
    %c64_118 = arith.constant 64 : index
    %c0_119 = arith.constant 0 : index
    %145 = vector.load %arg6[%c64_118, %c0_119] : memref<144x256xf32, #tpu.memory_space<vmem>>, vector<16x256xf32>
    tpu.vector_store %arg6[%c64_118, %c0_119], %144 {strides = array<i32>} : memref<144x256xf32, #tpu.memory_space<vmem>>, vector<16x256xf32>,
    %c0_120 = arith.constant 0 : index
    %c129_121 = arith.constant 129 : index
    %146 = vector.load %arg5[%c0_120, %c129_121] : memref<16x512xf32, #tpu.memory_space<vmem>>, vector<16x256xf32>
    %147 = vector.broadcast %44 : vector<1x256xf32> to vector<16x256xf32>
    %148 = arith.mulf %146, %147 : vector<16x256xf32>
    %c80_122 = arith.constant 80 : index
    %c0_123 = arith.constant 0 : index
    %149 = vector.load %arg6[%c80_122, %c0_123] : memref<144x256xf32, #tpu.memory_space<vmem>>, vector<16x256xf32>
    tpu.vector_store %arg6[%c80_122, %c0_123], %148 {strides = array<i32>} : memref<144x256xf32, #tpu.memory_space<vmem>>, vector<16x256xf32>,
    %c0_124 = arith.constant 0 : index
    %c143_125 = arith.constant 143 : index
    %150 = vector.load %arg5[%c0_124, %c143_125] : memref<16x512xf32, #tpu.memory_space<vmem>>, vector<16x256xf32>
    %151 = vector.broadcast %33 : vector<1x256xf32> to vector<16x256xf32>
    %152 = arith.mulf %150, %151 : vector<16x256xf32>
    %c96_126 = arith.constant 96 : index
    %c0_127 = arith.constant 0 : index
    %153 = vector.load %arg6[%c96_126, %c0_127] : memref<144x256xf32, #tpu.memory_space<vmem>>, vector<16x256xf32>
    tpu.vector_store %arg6[%c96_126, %c0_127], %152 {strides = array<i32>} : memref<144x256xf32, #tpu.memory_space<vmem>>, vector<16x256xf32>,
    %c0_128 = arith.constant 0 : index
    %c144_129 = arith.constant 144 : index
    %154 = vector.load %arg5[%c0_128, %c144_129] : memref<16x512xf32, #tpu.memory_space<vmem>>, vector<16x256xf32>
    %c112_130 = arith.constant 112 : index
    %c0_131 = arith.constant 0 : index
    %155 = vector.load %arg6[%c112_130, %c0_131] : memref<144x256xf32, #tpu.memory_space<vmem>>, vector<16x256xf32>
    tpu.vector_store %arg6[%c112_130, %c0_131], %154 {strides = array<i32>} : memref<144x256xf32, #tpu.memory_space<vmem>>, vector<16x256xf32>,
    %c0_132 = arith.constant 0 : index
    %c145_133 = arith.constant 145 : index
    %156 = vector.load %arg5[%c0_132, %c145_133] : memref<16x512xf32, #tpu.memory_space<vmem>>, vector<16x256xf32>
    %157 = vector.broadcast %44 : vector<1x256xf32> to vector<16x256xf32>
    %158 = arith.mulf %156, %157 : vector<16x256xf32>
    %c128_134 = arith.constant 128 : index
    %c0_135 = arith.constant 0 : index
    %159 = vector.load %arg6[%c128_134, %c0_135] : memref<144x256xf32, #tpu.memory_space<vmem>>, vector<16x256xf32>
    tpu.vector_store %arg6[%c128_134, %c0_135], %158 {strides = array<i32>} : memref<144x256xf32, #tpu.memory_space<vmem>>, vector<16x256xf32>,
    %c2 = arith.constant 2 : index
    %c0_136 = arith.constant 0 : index
    %c0_137 = arith.constant 0 : index
    %160 = vector.load %arg2[%c2, %c0_136, %c0_137] : memref<3x8x144xf32, #tpu.memory_space<vmem>>, vector<1x8x144xf32>
    %161 = vector.shape_cast %160 : vector<1x8x144xf32> to vector<8x144xf32>
    %c0_138 = arith.constant 0 : index
    %c0_139 = arith.constant 0 : index
    %162 = vector.load %arg6[%c0_138, %c0_139] : memref<144x256xf32, #tpu.memory_space<vmem>>, vector<144x256xf32>
    %cst_140 = arith.constant dense<0.000000e+00> : vector<8x256xf32>
    %163 = tpu.matmul %161, %162, %cst_140 {dimension_numbers = #tpu.dot_dimension_numbers<[1], [0], [0], [1], [0, 0, 1, 1], [], []>} : vector<8x144xf32>, vector<144x256xf32>, vector<8x256xf32> -> vector<8x256xf32>
    %c2_141 = arith.constant 2 : index
    %c0_142 = arith.constant 0 : index
    %c0_143 = arith.constant 0 : index
    %164 = vector.load %arg3[%c2_141, %c0_142, %c0_143] : memref<3x8x1xf32, #tpu.memory_space<vmem>>, vector<1x8x1xf32>
    %165 = vector.shape_cast %164 : vector<1x8x1xf32> to vector<8x1xf32>
    %166 = vector.broadcast %165 : vector<8x1xf32> to vector<8x256xf32>
    %167 = arith.addf %163, %166 : vector<8x256xf32>
    %cst_144 = arith.constant 0.000000e+00 : f32
    %168 = vector.broadcast %cst_144 : f32 to vector<8x256xf32>
    %169 = arith.maximumf %167, %168 : vector<8x256xf32>
    %c0_145 = arith.constant 0 : index
    %c0_146 = arith.constant 0 : index
    %c0_147 = arith.constant 0 : index
    %170 = vector.load %arg4[%c0_145, %c0_146, %c0_147] : memref<1x8x256xf32, #tpu.memory_space<vmem>>, vector<1x8x256xf32>
    %171 = vector.shape_cast %170 : vector<1x8x256xf32> to vector<8x256xf32>
    %172 = vector.shape_cast %169 : vector<8x256xf32> to vector<1x8x256xf32>
    tpu.vector_store %arg4[%c0_145, %c0_146, %c0_147], %172 {strides = array<i32>} : memref<1x8x256xf32, #tpu.memory_space<vmem>>, vector<1x8x256xf32>,
    return
  }
  func.func @transform_0(%arg0: i32) -> (i32, i32, i32) {
    %c0_i32 = arith.constant 0 : i32
    %c0_i32_0 = arith.constant 0 : i32
    %c0_i32_1 = arith.constant 0 : i32
    return %arg0, %c0_i32, %c0_i32_0 : i32, i32, i32
  }
  func.func @transform_1(%arg0: i32) -> (i32, i32, i32) {
    %c0_i32 = arith.constant 0 : i32
    %c0_i32_0 = arith.constant 0 : i32
    %c0_i32_1 = arith.constant 0 : i32
    %c0_i32_2 = arith.constant 0 : i32
    return %c0_i32, %c0_i32_0, %c0_i32_1 : i32, i32, i32
  }
  func.func @transform_2(%arg0: i32) -> (i32, i32, i32) {
    %c0_i32 = arith.constant 0 : i32
    %c0_i32_0 = arith.constant 0 : i32
    %c0_i32_1 = arith.constant 0 : i32
    %c0_i32_2 = arith.constant 0 : i32
    return %c0_i32, %c0_i32_0, %c0_i32_1 : i32, i32, i32
  }
  func.func @transform_3(%arg0: i32) -> (i32, i32, i32) {
    %c0_i32 = arith.constant 0 : i32
    %c0_i32_0 = arith.constant 0 : i32
    %c0_i32_1 = arith.constant 0 : i32
    return %arg0, %c0_i32, %c0_i32_0 : i32, i32, i32
  }
}

</mosaic_0001>

<bundles_post_ra>
// kernel: tpu_custom_call.1
= control target key start
LH: loop header
LB: loop body
LE: loop exit
PB: predicated region body
PF: predicated region fallthrough
CT: control target
= control target key end

     0   :  { %8 = vsyncpa [#allocation5], 0  ;;  %s2710_s0 = inlined_call_operand.vmem [shape: f32[2,4,256], index: 0, kind: input, shape index: {}]   ;;  %s2711_s1 = inlined_call_operand.hbm [shape: f32[3,8,144], index: 1, kind: input, shape index: {}]   ;;  %s2712_s2 = inlined_call_operand.vmem [shape: f32[3,8,1], index: 2, kind: input, shape index: {}]   ;;  %s2713_s3 = inlined_call_operand.hbm [shape: f32[2,8,256], index: 3, kind: output, shape index: {}]  }
   0x1   :  { %9 = vsyncpa [#allocation6], 0 }
   0x2   :  { %11 = vsyncpa [#allocation6 + $0x1], 0  ;;  %s1986_s12 = smov 0   ;;  %s1988_s13 = smov 0  }
   0x3   :  { %s1990_s14 = smov 0   ;;  %s1992_s15 = smov 0  }
   0x4 LB: > { %s2007_s16 = sadd.s32 4294967295, %s1950_s15   ;;  %s1627_s17 = sadd.s32 4294967294, %s1950_s15   ;;  %s1950_s15 = sphi %s1992_s15, %s2729_s15   ;;  %s1946_s14 = sphi %s1990_s14, %s2728_s14   ;;  %s1942_s13 = sphi %s1988_s13, %s2727_s13   ;;  %s1938_s12 = sphi %s1986_s12, %s2726_s12  }
   0x5   : > { %s2011_s18 = sadd.s32 1, %s1950_s15   ;;  %s92_s19 = sadd.s32 1, %s1946_s14 }
   0x6   : > { %s89_s20 = ssub.s32 %s1950_s15, %s2011_s18  ;;  %p102_p0 = scmp.ne.s32.totalorder %s1946_s14, %s1942_s13 }
   0x7   : > { %p90_p1 = scmp.eq.s32.totalorder %s89_s20, 0  ;;  %p103_p2 = scmp.eq.s32.totalorder %s2007_s16, 1 }
   0x8   : > { %p108_p3 = scmp.ne.s32.totalorder %s1942_s13, %s1938_s12  ;;  %p109_p4 = scmp.eq.s32.totalorder %s1627_s17, 1 }
   0x9   : > { %s2022_s21 = scalar_select %p90_p1, %s1946_s14, %s92_s19  }
   0xa   : > { %p2024_p5 = por %p103_p2, %p102_p0  ;;  %p2028_p6 = por %p109_p4, %p108_p3 }
   0xb   : > { %p1628_p7 = scmp.ge.s32.totalorder %s1950_s15, 1  ;;  %p116_p8 = scmp.lt.s32.totalorder %s1950_s15, 3 }
   0xc   : > { %s2717_s22 = scalar_select %p2024_p5, 1, 0 }
   0xd   : > { %s2718_s23 = scalar_select %p2028_p6, 1, 0 }
   0xe   : > { %p2714_p9 = scmp.eq.s32.totalorder %s2007_s16, 0  ;;  %p2035_p10 = pnand %p1628_p7, %p116_p8 }
   0xf   : > { %s1952_s25 = smov [#allocation4]   ;;  %s1856_s30 = scalar_lea.hbm %s2711_s1, 768 }
  0x10   : > { %s2719_s24 = scalar_select %p2035_p10, 1, 0 }
  0x11   : > { %s128_s26 = sshll.u32 %s1952_s25, 4  ;;  %p1766_p11 = pneg %p2035_p10  ;;  %s129_s26 = int_to_ptr.vmem [resolvable:$true] %s128_s26 }
  0x12   : > { %p1857_p13 = scmp.ne.s32.totalorder %s2711_s1, %s1856_s30  ;;  %p1863_p3 = scmp.lt.u32.totalorder %s1856_s30, %s2711_s1 }
  0x13   : > { %p2043_p12 = pnand %p2714_p9, %p1766_p11 }
  0x15   : > { %p1858_p0 = pneg %p2043_p12 }
  0x17   : > { %p1859_p1 = pnand %p1858_p0, %p1857_p13 }
  0x19   : > { %p1860_p2 = pneg %p1859_p1 }
  0x1b   : > { %p1865_p4 = pnand %p1863_p3, %p1860_p2 }
  0x1d   : > { %1868 = shalt.err (!%p1865_p4)
}
  0x1e   : > { %s1869_s8 = scalar_lea.vmem %s129_s26, 768  ;;  %p1877_p9 = scmp.lt.s32.totalorder %s129_s26, %s129_s26 }
  0x1f   : > { %p1870_p7 = scmp.ne.s32.totalorder %s129_s26, %s1869_s8  ;;  %p1878_p6 = scmp.lt.s32.totalorder %s1869_s8, %s1869_s8 }
  0x21   : > { %p1872_p8 = pnand %p1870_p7, %p1858_p0  ;;  %p1879_p5 = por %p1878_p6, %p1877_p9 }
  0x23   : > { %p1873_p11 = pneg %p1872_p8 }
  0x25   : > { %p1880_p10 = pnand %p1879_p5, %p1873_p11 }
  0x27   : > { %1883 = shalt.err (!%p1880_p10)
}
  0x28   : > { %s1953_s9 = smov 256   ;;  %s1954_s10 = smov 16  }
  0x29   : > { %1769 = dma.hbm_to_vmem [thread:$0]  (!%p2043_p12), %s2711_s1, 768, %s129_s26, [#allocation5], %s1953_s9, %s1953_s9, %s1954_s10  }
  0x2a   : > { %p2721_p13 = scmp.ne.s32.totalorder %s2719_s24, 0 }
  0x2b   : > { %v224_v0 = vlaneseq (!%p2721_p13)  ;;  %p2722_p0 = scmp.eq.s32.totalorder (!%p2721_p13), %s2007_s16, 0 }
  0x2c   : > { %155 = sbr.rel (%p2721_p13) target bundleno = 1356 (0x54c), region = 32 }
  0x33   : > { %1929 = dma.done.wait (%p2722_p0), [#allocation5], 768   ;;  %p2723_p1 = pmov %p2722_p0 }
  0x34   : > { %v1955_v1 = vmov 0.0   ;;  %v225_v2 = vand.u32 127, %v224_v0  ;;  %p179_p5 = scmp.lt.s32.totalorder %s2007_s16, 1  ;;  %s1956_s27 = smov 111   ;;  %v1963_v21 = vmov 0   ;;  %vm290_vm4 = vcmask 908288  }
  0x35   : > { %1931 = vsyncadd (%p2723_p1), [#allocation5], 4294966528  ;;  %184 = vst [vmem:[#allocation2] sm:$0xff] %v1955_v1  ;;  %s1957_s28 = smov 127   ;;  %s1958_s29 = smov 113   ;;  %1852 = vset.pattern.permute.xlu0 %v1963_v21  ;;  %1853 = vset.pattern.permute.xlu1 %v1963_v21  ;;  %vm373_vm5 = vcmask 1039360  }
  0x36   : > { %185 = vst [vmem:[#allocation2 + $0x20] sm:$0xff] %v1955_v1  ;;  %187 = vst [vmem:[#allocation2 + $0x38] sm:$0xff] %v1955_v1  ;;  %v226_v3 = vadd.s32 128, %v225_v2  ;;  %v231_v4 = vand.u32 15, %v225_v2  ;;  %s180_s19 = scalar_select %p179_p5, %s2007_s16, 1  ;;  %vm342_vm6 = vcmask 924672  }
  0x37   : > { %188 = vst [vmem:[#allocation3] sm:$0xff] %v1955_v1  ;;  %189 = vst [vmem:[#allocation3 + $0x8] sm:$0xff] %v1955_v1  ;;  %s1959_s30 = smov 1   ;;  %s1960_s4 = smov 15   ;;  %vm326_vm7 = vcmask 130048   ;;  %vm359_vm8 = vcmask 121856  }
  0x38   : > { %190 = vst [vmem:[#allocation3 + $0x10] sm:$0xff] %v1955_v1  ;;  %191 = vst [vmem:[#allocation3 + $0x18] sm:$0xff] %v1955_v1  ;;  %v238_v5 = vand.u32 15, %v226_v3  ;;  %v251_v6 = vadd.s32 4294967295, %v231_v4  ;;  %v263_v7 = vadd.s32 1, %v231_v4  ;;  %s1650_s20 = sshll.u32 %s180_s19, 3 }
  0x39   : > { %192 = vst [vmem:[#allocation3 + $0x20] sm:$0xff] %v1955_v1  ;;  %193 = vst [vmem:[#allocation3 + $0x28] sm:$0xff] %v1955_v1  ;;  %s183_s26 = scalar_lea.vmem %s2710_s0, %s1650_s20  ;;  %s1961_s5 = smov 17   ;;  %vm390_vm9 = vcmask 7168   ;;  %vm307_vm10 = vcmask 138240   ;;  %vm471_vm11 = vcmask 916480  }
  0x3a   : > { %194 = vst [vmem:[#allocation3 + $0x30] sm:$0xff] %v1955_v1  ;;  %195 = vst [vmem:[#allocation3 + $0x38] sm:$0xff] %v1955_v1  ;;  %v252_v8 = vadd.s32 4294967295, %v238_v5  ;;  %vm253_vm0 = vcmp.ge.s32.totalorder %v251_v6, 0  ;;  %v264_v9 = vadd.s32 1, %v238_v5  ;;  %vm267_vm1 = vcmp.lt.s32.totalorder %v263_v7, 16 }
  0x3b   : > { %196 = vst [vmem:[#allocation3 + $0x40] sm:$0xff] %v1955_v1  ;;  %197 = vst [vmem:[#allocation3 + $0x48] sm:$0xff] %v1955_v1  ;;  %v1636_v10 = vsel %vm253_vm0, 1.0, %v1955_v1  ;;  %v275_v11 = vld [vmem:[%s183_s26] sm:$0xff]  ;;  %v1638_v14 = vsel %vm267_vm1, 1.0, %v1955_v1  ;;  %s1962_s6 = smov 16  }
  0x3c   : > { %198 = vst [vmem:[#allocation3 + $0x50] sm:$0xff] %v1955_v1  ;;  %199 = vst [vmem:[#allocation3 + $0x58] sm:$0xff] %v1955_v1  ;;  %vm254_vm2 = vcmp.ge.s32.totalorder %v252_v8, 0  ;;  %vm268_vm3 = vcmp.lt.s32.totalorder %v264_v9, 16  ;;  %v277_v12 = vcombine.high %v275_v11, %v275_v11  ;;  %s1964_s7 = smov 112   ;;  %s176_s20 = sand.u32 1, %s1942_s13  }
  0x3d   : > { %200 = vst [vmem:[#allocation3 + $0x60] sm:$0xff] %v1955_v1  ;;  %201 = vst [vmem:[#allocation3 + $0x68] sm:$0xff] %v1955_v1  ;;  %v1637_v13 = vsel %vm254_vm2, 1.0, %v1955_v1  ;;  %v1639_v15 = vsel %vm268_vm3, 1.0, %v1955_v1  ;;  %v314_v18 = vld [vmem:[#allocation2 + $0x20] sm:$0xf] }
  0x3e   : > { %202 = vst [vmem:[#allocation3 + $0x70] sm:$0xff] %v1955_v1  ;;  %203 = vst [vmem:[#allocation3 + $0x78] sm:$0xff] %v1955_v1  ;;  %v1822_v16 = vpack.i.bf16 %v1637_v13, %v1636_v10  ;;  %v1827_v17 = vpack.i.bf16 %v1639_v15, %v1638_v14  ;;  %v281_v24 = vld [vmem:[#allocation2 + $0x20] sm:$0xf]  ;;  %v403_v54 = vld [vmem:[#allocation2 + $0x38] sm:$0xf] }
  0x3f   : > { %204 = vst [vmem:[#allocation3 + $0x80] sm:$0xff] %v1955_v1  ;;  %205 = vst [vmem:[#allocation3 + $0x88] sm:$0xff] %v1955_v1  ;;  %v333_v32 = vld [vmem:[#allocation2 + $0x20] sm:$0xf]  ;;  %v432_v9 = vld [vmem:[#allocation2 + $0x38] sm:$0xf] }
  0x40   : > { %206 = vst [vmem:[#allocation3 + $0x90] sm:$0xff] %v1955_v1  ;;  %207 = vst [vmem:[#allocation3 + $0x98] sm:$0xff] %v1955_v1  ;;  %1823 = vrot.lane.b32.xlu0 %v1822_v16, %s1956_s27  ;;  %1833 = vrot.lane.b32.xlu1 %v1822_v16, %s1957_s28  ;;  %v366_v38 = vld [vmem:[#allocation2 + $0x20] sm:$0xf]  ;;  %s1633_s24 = sshll.u32 %s176_s20, 4  ;;  %s1651_s25 = sshll.u32 %s2007_s16, 8 }
  0x41   : > { %208 = vst [vmem:[#allocation3 + $0xa0] sm:$0xff] %v1955_v1  ;;  %209 = vst [vmem:[#allocation3 + $0xa8] sm:$0xff] %v1955_v1  ;;  %s178_s26 = scalar_lea.vmem [#allocation7], %s1633_s24  ;;  %p2724_p9 = scmp.ne.s32.totalorder %s2717_s22, 0 }
  0x42   : > { %210 = vst [vmem:[#allocation3 + $0xb0] sm:$0xff] %v1955_v1  ;;  %211 = vst [vmem:[#allocation3 + $0xb8] sm:$0xff] %v1955_v1  ;;  %s1965_s16 = smov [#allocation7]  }
  0x43   : > { %212 = vst [vmem:[#allocation3 + $0xc0] sm:$0xff] %v1955_v1  ;;  %213 = vst [vmem:[#allocation3 + $0xc8] sm:$0xff] %v1955_v1 }
  0x44   : > { %214 = vst [vmem:[#allocation3 + $0xd0] sm:$0xff] %v1955_v1  ;;  %215 = vst [vmem:[#allocation3 + $0xd8] sm:$0xff] %v1955_v1  ;;  %1828 = vrot.lane.b32.xlu0 %v1827_v17, %s1958_s29  ;;  %1838 = vrot.lane.b32.xlu1 %v1827_v17, %s1959_s30 }
  0x45   : > { %216 = vst [vmem:[#allocation3 + $0xe0] sm:$0xff] %v1955_v1  ;;  %217 = vst [vmem:[#allocation3 + $0xe8] sm:$0xff] %v1955_v1 }
  0x46   : > { %218 = vst [vmem:[#allocation3 + $0xf0] sm:$0xff] %v1955_v1  ;;  %219 = vst [vmem:[#allocation3 + $0xf8] sm:$0xff] %v1955_v1 }
  0x47   : > { %220 = vst [vmem:[#allocation3 + $0x100] sm:$0xff] %v1955_v1  ;;  %221 = vst [vmem:[#allocation3 + $0x108] sm:$0xff] %v1955_v1 }
  0x48   : > { %222 = vst [vmem:[#allocation3 + $0x110] sm:$0xff] %v1955_v1  ;;  %223 = vst [vmem:[#allocation3 + $0x118] sm:$0xff] %v1955_v1  ;;  %1843 = vrot.lane.b32.xlu0 %v1822_v16, %s1960_s4  ;;  %1848 = vrot.lane.b32.xlu1 %v1827_v17, %s1961_s5 }
  0x49   : > { %279 = vst [vmem:[#allocation2 + $0x28] sm:$0xf] %v275_v11  ;;  %280 = vst [vmem:[#allocation2 + $0x30] sm:$0xf] %v277_v12 }
  0x4c   : > { %320 = vrot.lane.b32.xlu1 %v314_v18, %s1962_s6 }
  0x50   : > { %v316_v19 = vld [vmem:[#allocation2 + $0x30] sm:$0xf]  ;;  %v315_v20 = vld [vmem:[#allocation2 + $0x28] sm:$0xf] }
  0x51   : > { %324 = vrot.lane.b32.xlu0 %v316_v19, %s1962_s6  ;;  %322 = vrot.lane.b32.xlu1 %v315_v20, %s1962_s6  ;;  %v283_v23 = vld [vmem:[#allocation2 + $0x30] sm:$0xf]  ;;  %v282_v41 = vld [vmem:[#allocation2 + $0x28] sm:$0xf]  ;;  %v461_v20 = vld [vmem:[#allocation2 + $0x38] sm:$0xf] }
  0x52   : > { %v335_v31 = vld [vmem:[#allocation2 + $0x30] sm:$0xf]  ;;  %v367_v45 = vld [vmem:[#allocation2 + $0x28] sm:$0xf] }
  0x53   : > { %v368_v47 = vld [vmem:[#allocation2 + $0x30] sm:$0xf]  ;;  %v334_v57 = vld [vmem:[#allocation2 + $0x28] sm:$0xf] }
  0x54   : > { %v430_v2 = vld [vmem:[#allocation2 + $0x28] sm:$0xf]  ;;  %v431_v7 = vld [vmem:[#allocation2 + $0x30] sm:$0xf] }
  0x55   : > { %v401_v3 = vld [vmem:[#allocation2 + $0x28] sm:$0xf]  ;;  %v398_v12 = vld [vmem:[#allocation2 + $0x30] sm:$0xf] }
  0x56   : > { %400 = vst [vmem:[#allocation3 + $0x88] sm:$0xf] %v398_v12  ;;  %v397_v15 = vld [vmem:[#allocation2 + $0x28] sm:$0xf]  ;;  %v402_v16 = vld [vmem:[#allocation2 + $0x30] sm:$0xf] }
  0x57   : > { %399 = vst [vmem:[#allocation3 + $0x80] sm:$0xf] %v397_v15  ;;  %v794_v18 = vld [vmem:[#allocation2 + $0x30] sm:$0xf]  ;;  %v793_v19 = vld [vmem:[#allocation2 + $0x28] sm:$0xf] }
  0x58   : > { %v479_v21 = vld [vmem:[#allocation2 + $0x30] sm:$0xf]  ;;  %798 = vst [vmem:[#allocation3 + $0x98] sm:$0xf] %v794_v18  ;;  %797 = vst [vmem:[#allocation3 + $0x90] sm:$0xf] %v793_v19 }
  0x59   : > { %v845_v12 = vld [vmem:[#allocation2 + $0x30] sm:$0xf] }
  0xb2   : > { %v1824_v22 = vpop.permute.xlu0 %1823  ;;  %v1834_v25 = vpop.permute.xlu1 %1833 }
  0xb3   : > { %v2126_v26 = vunpack.i.h.bf16 %v1824_v22  ;;  %v2128_v27 = vunpack.i.l.bf16 %v1824_v22  ;;  %v2138_v36 = vunpack.i.l.bf16 %v1834_v25  ;;  %v2140_v37 = vunpack.i.h.bf16 %v1834_v25  ;;  %v460_v25 = vld [vmem:[#allocation2 + $0x30] sm:$0xf] }
  0xb5   : > { %v297_v28 = vmul.f32 %v2126_v26, %v283_v23  ;;  %v295_v29 = vmul.f32 %v2128_v27, %v281_v24  ;;  %v2147_v42 = vsel %vm290_vm4, %v2128_v27, %v2126_v26  ;;  %v378_v44 = vmul.f32 %v2138_v36, %v366_v38 }
  0xb6   : > { %v1829_v30 = vpop.permute.xlu0 %1828  ;;  %v1839_v33 = vpop.permute.xlu1 %1838  ;;  %v2155_v46 = vsel %vm373_vm5, %v2138_v36, %v2140_v37  ;;  %v296_v49 = vmul.f32 %v2147_v42, %v282_v41  ;;  %v380_v53 = vmul.f32 %v2140_v37, %v368_v47  ;;  %v545_v41 = vld [vmem:[%s2712_s2] sm:$0xff] }
  0xb7   : > { %v2132_v34 = vunpack.i.h.bf16 %v1829_v30  ;;  %v2134_v35 = vunpack.i.l.bf16 %v1829_v30  ;;  %305 = vrot.lane.b32.xlu1 %v297_v28, %s1961_s5  ;;  %301 = vrot.lane.b32.xlu0 %v295_v29, %s1961_s5  ;;  %v2160_v51 = vunpack.i.h.bf16 %v1839_v33  ;;  %v379_v52 = vmul.f32 %v2155_v46, %v367_v45  ;;  %v478_v28 = vld [vmem:[#allocation2 + $0x28] sm:$0xf]  ;;  %v674_v47 = vld [vmem:[#allocation2 + $0x20] sm:$0xf] }
  0xb8   : > { %v2164_v56 = vunpack.i.l.bf16 %v1839_v33  ;;  %v459_v30 = vld [vmem:[#allocation2 + $0x28] sm:$0xf]  ;;  %v2230_v45 = vmul.f32 0.0, %v2128_v27 }
  0xb9   : > { %v349_v39 = vmul.f32 %v2132_v34, %v335_v31  ;;  %v347_v40 = vmul.f32 %v2134_v35, %v333_v32  ;;  %v2169_v58 = vsel %vm342_vm6, %v2134_v35, %v2132_v34  ;;  %v414_v61 = vmul.f32 %v2160_v51, %v403_v54  ;;  %v634_v31 = vld [vmem:[#allocation2 + $0x30] sm:$0xf]  ;;  %v480_v32 = vld [vmem:[#allocation2 + $0x38] sm:$0xf] }
  0xba   : > { %v1849_v43 = vpop.permute.xlu1 %1848  ;;  %v1844_v48 = vpop.permute.xlu0 %1843  ;;  %v348_v4 = vmul.f32 %v2169_v58, %v334_v57  ;;  %v412_v6 = vmul.f32 %v2164_v56, %v401_v3  ;;  %v2201_v17 = vsel %vm390_vm9, %v2164_v56, %v2160_v51  ;;  %v640_v33 = vmul.f32 %v2126_v26, %v634_v31  ;;  %v754_v54 = vld [vmem:[#allocation2 + $0x30] sm:$0xf] }
  0xbb   : > { %357 = vrot.lane.b32.xlu1 %v349_v39, %s1960_s4  ;;  %353 = vrot.lane.b32.xlu0 %v347_v40, %s1960_s4  ;;  %v2173_v60 = vunpack.i.l.bf16 %v1844_v48  ;;  %v2178_v0 = vunpack.i.h.bf16 %v1844_v48  ;;  %v2194_v13 = vunpack.i.h.bf16 %v1849_v43  ;;  %v2196_v14 = vunpack.i.l.bf16 %v1849_v43  ;;  %v632_v39 = vld [vmem:[#allocation2 + $0x20] sm:$0xf]  ;;  %v508_v40 = vld [vmem:[#allocation4 + $0x8] sm:$0xff] }
  0xbc   : > { %v413_v23 = vmul.f32 %v2201_v17, %v402_v16  ;;  %1640 = vmatprep.mubr.msk.f32.mxu0 %vm326_vm7, %v508_v40  ;;  %v638_v43 = vmul.f32 %v2128_v27, %v632_v39  ;;  %v675_v48 = vld [vmem:[#allocation2 + $0x28] sm:$0xf]  ;;  %v2250_v57 = vmul.f32 0.0, %v2138_v36  ;;  %v846_v16 = vld [vmem:[#allocation2 + $0x38] sm:$0xf] }
  0xbd   : > { %v441_v5 = vmul.f32 %v2173_v60, %v430_v2  ;;  %v2188_v8 = vsel %vm359_vm8, %v2173_v60, %v2178_v0  ;;  %v443_v11 = vmul.f32 %v2178_v0, %v432_v9  ;;  %v2208_v22 = vsel %vm307_vm10, %v2196_v14, %v2194_v13  ;;  %v803_v9 = vld [vmem:[#allocation2 + $0x30] sm:$0xf] }
  0xbe   : > { %v321_v50 = vpop.permute.xlu1 %320  ;;  %v442_v10 = vmul.f32 %v2188_v8, %v431_v7  ;;  %v490_v24 = vmul.f32 %v2208_v22, %v479_v21  ;;  %v489_v29 = vmul.f32 %v2196_v14, %v478_v28  ;;  %v491_v38 = vmul.f32 %v2194_v13, %v480_v32  ;;  %v802_v7 = vld [vmem:[#allocation2 + $0x28] sm:$0xf] }
  0xbf   : > { %384 = vrot.lane.b32.xlu1 %v378_v44, %s1959_s30  ;;  %303 = vrot.lane.b32.xlu0 %v296_v49, %s1961_s5  ;;  %v676_v44 = vld [vmem:[#allocation2 + $0x30] sm:$0xf]  ;;  %v2260_v2 = vmul.f32 0.0, %v2160_v51  ;;  %v2275_v15 = vmul.f32 0.0, %v2178_v0  ;;  %v852_v18 = vmul.f32 %v2178_v0, %v846_v16  ;;  %v525_v16 = vld [vmem:[#allocation3 + $0x80] sm:$0xff] }
  0xc0   : > { %v712_v49 = vld [vmem:[#allocation2 + $0x30] sm:$0xf] }
  0xc3   : > { %v325_v55 = vpop.permute.xlu0 %324  ;;  %v323_v59 = vpop.permute.xlu1 %322  ;;  %386 = vrot.lane.b32.xlu1 %v379_v52, %s1959_s30  ;;  %388 = vrot.lane.b32.xlu0 %v380_v53, %s1959_s30  ;;  %v710_v52 = vld [vmem:[#allocation2 + $0x20] sm:$0xf]  ;;  %v2243_v53 = vmul.f32 0.0, %v2134_v35 }
  0xc4   : > { %v327_v62 = vsel %vm326_vm7, %v321_v50, %v323_v59  ;;  %v328_v63 = vsel %vm326_vm7, %v323_v59, %v325_v55  ;;  %v718_v50 = vmul.f32 %v2132_v34, %v712_v49  ;;  %v716_v27 = vmul.f32 %v2134_v35, %v710_v52  ;;  %v752_v59 = vld [vmem:[#allocation2 + $0x20] sm:$0xf] }
  0xc5   : > { %331 = vst [vmem:[#allocation3 + $0x20] sm:$0xf] %v327_v62  ;;  %332 = vst [vmem:[#allocation3 + $0x28] sm:$0xf] %v328_v63  ;;  %v760_v55 = vmul.f32 %v2140_v37, %v754_v54  ;;  %v758_v35 = vmul.f32 %v2138_v36, %v752_v59  ;;  %v711_v63 = vld [vmem:[#allocation2 + $0x28] sm:$0xf] }
  0xc6   : > { %v717_v3 = vmul.f32 %v711_v63, %v2169_v58 }
  0xc7   : > { %422 = vrot.lane.b32.xlu1 %v414_v61, %s1957_s28  ;;  %355 = vrot.lane.b32.xlu0 %v348_v4, %s1960_s4  ;;  %v633_v61 = vld [vmem:[#allocation2 + $0x28] sm:$0xf]  ;;  %v804_v4 = vld [vmem:[#allocation2 + $0x38] sm:$0xf] }
  0xc8   : > { %v639_v62 = vmul.f32 %v633_v61, %v2147_v42  ;;  %v810_v36 = vmul.f32 %v2160_v51, %v804_v4  ;;  %v851_v51 = vmul.f32 %v845_v12, %v2188_v8 }
  0xcb   : > { %447 = vrot.lane.b32.xlu1 %v441_v5, %s1958_s29  ;;  %418 = vrot.lane.b32.xlu0 %v412_v6, %s1957_s28  ;;  %v753_v5 = vld [vmem:[#allocation2 + $0x28] sm:$0xf] }
  0xcc   : > { %v759_v6 = vmul.f32 %v753_v5, %v2155_v46 }
  0xcf   : > { %449 = vrot.lane.b32.xlu1 %v442_v10, %s1958_s29  ;;  %451 = vrot.lane.b32.xlu0 %v443_v11, %s1958_s29  ;;  %v808_v10 = vmul.f32 %v2164_v56, %v802_v7  ;;  %v809_v11 = vmul.f32 %v803_v9, %v2201_v17 }
  0xd3   : > { %469 = vrot.lane.b32.xlu1 %v461_v20, %s1964_s7  ;;  %420 = vrot.lane.b32.xlu0 %v413_v23, %s1957_s28 }
  0xd7   : > { %497 = vrot.lane.b32.xlu1 %v490_v24, %s1956_s27  ;;  %467 = vrot.lane.b32.xlu0 %v460_v25, %s1964_s7 }
  0xdb   : > { %495 = vrot.lane.b32.xlu1 %v489_v29, %s1956_s27  ;;  %465 = vrot.lane.b32.xlu0 %v459_v30, %s1964_s7 }
  0xdf   : > { %657 = vrot.lane.b32.xlu1 %v640_v33, %s1961_s5  ;;  %499 = vrot.lane.b32.xlu0 %v491_v38, %s1956_s27 }
  0xe3   : > { %653 = vrot.lane.b32.xlu1 %v638_v43, %s1961_s5  ;;  %548 = vperm.xlu0 %1852, %v545_v41  }
  0xe7   : > { %693 = vrot.lane.b32.xlu1 %v676_v44, %s1962_s6  ;;  %647 = vrot.lane.b32.xlu0 %v2230_v45, %s1961_s5  ;;  %v514_v44 = vld [vmem:[#allocation3 + $0x28] sm:$0xff] }
  0xe8   : > { %v1656_v52 = vpack.c.bf16 %v1955_v1, %v514_v44 }
  0xeb   : > { %689 = vrot.lane.b32.xlu1 %v674_v47, %s1962_s6  ;;  %691 = vrot.lane.b32.xlu0 %v675_v48, %s1962_s6 }
  0xef   : > { %735 = vrot.lane.b32.xlu1 %v718_v50, %s1960_s4  ;;  %683 = vrot.lane.b32.xlu0 %v1955_v1, %s1962_s6 }
  0xf3   : > { %731 = vrot.lane.b32.xlu1 %v716_v27, %s1960_s4  ;;  %725 = vrot.lane.b32.xlu0 %v2243_v53, %s1960_s4  ;;  %v513_v27 = vld [vmem:[#allocation3 + $0x20] sm:$0xff] }
  0xf4   : > { %v1658_v54 = vpack.c.bf16 %v1955_v1, %v513_v27 }
  0xf7   : > { %777 = vrot.lane.b32.xlu1 %v760_v55, %s1959_s30  ;;  %767 = vrot.lane.b32.xlu0 %v2250_v57, %s1959_s30 }
  0xfb   : > { %773 = vrot.lane.b32.xlu1 %v758_v35, %s1959_s30  ;;  %655 = vrot.lane.b32.xlu0 %v639_v62, %s1961_s5 }
  0xff   : > { %821 = vrot.lane.b32.xlu1 %v2260_v2, %s1957_s28  ;;  %733 = vrot.lane.b32.xlu0 %v717_v3, %s1960_s4 }
 0x103   : > { %827 = vrot.lane.b32.xlu1 %v810_v36, %s1957_s28  ;;  %775 = vrot.lane.b32.xlu0 %v759_v6, %s1959_s30  ;;  %v526_v36 = vld [vmem:[#allocation3 + $0x88] sm:$0xff] }
 0x107   : > { %823 = vrot.lane.b32.xlu1 %v808_v10, %s1957_s28  ;;  %825 = vrot.lane.b32.xlu0 %v809_v11, %s1957_s28 }
 0x10b   : > { %863 = vrot.lane.b32.xlu1 %v2275_v15, %s1958_s29  ;;  %867 = vrot.lane.b32.xlu0 %v851_v51, %s1958_s29  ;;  %v1668_v51 = vpack.c.bf16 %v1955_v1, %v526_v36 }
 0x10f   : > { %869 = vrot.lane.b32.xlu1 %v852_v18, %s1958_s29 }
 0x129   : > { %v306_v19 = vpop.permute.xlu1 %305  ;;  %v302_v20 = vpop.permute.xlu0 %301 }
 0x12d   : > { %v358_v21 = vpop.permute.xlu1 %357  ;;  %v354_v23 = vpop.permute.xlu0 %353 }
 0x131   : > { %v385_v24 = vpop.permute.xlu1 %384  ;;  %v304_v25 = vpop.permute.xlu0 %303 }
 0x132   : > { %v308_v28 = vsel %vm307_vm10, %v302_v20, %v304_v25  ;;  %v309_v29 = vsel %vm307_vm10, %v304_v25, %v306_v19 }
 0x133   : > { %312 = vst [vmem:[#allocation3] sm:$0xf] %v308_v28  ;;  %313 = vst [vmem:[#allocation3 + $0x8] sm:$0xf] %v309_v29 }
 0x135   : > { %v387_v30 = vpop.permute.xlu1 %386  ;;  %v389_v31 = vpop.permute.xlu0 %388 }
 0x136   : > { %v391_v32 = vsel %vm390_vm9, %v385_v24, %v387_v30  ;;  %v392_v0 = vsel %vm390_vm9, %v387_v30, %v389_v31 }
 0x137   : > { %395 = vst [vmem:[#allocation3 + $0x60] sm:$0xf] %v391_v32  ;;  %396 = vst [vmem:[#allocation3 + $0x68] sm:$0xf] %v392_v0 }
 0x139   : > { %v423_v33 = vpop.permute.xlu1 %422  ;;  %v356_v38 = vpop.permute.xlu0 %355 }
 0x13a   : > { %v360_v39 = vsel %vm359_vm8, %v354_v23, %v356_v38  ;;  %v361_v40 = vsel %vm359_vm8, %v356_v38, %v358_v21  ;;  %v510_v41 = vld [vmem:[#allocation3 + $0x8] sm:$0xff]  ;;  %v509_v43 = vld [vmem:[#allocation3] sm:$0xff]  ;;  %v1670_v23 = vpack.c.bf16 %v1955_v1, %v525_v16 }
 0x13b   : > { %364 = vst [vmem:[#allocation3 + $0x40] sm:$0xf] %v360_v39  ;;  %365 = vst [vmem:[#allocation3 + $0x48] sm:$0xf] %v361_v40  ;;  %v1652_v47 = vpack.c.bf16 %v1955_v1, %v510_v41  ;;  %v1654_v48 = vpack.c.bf16 %v1955_v1, %v509_v43 }
 0x13d   : > { %v448_v49 = vpop.permute.xlu1 %447  ;;  %1653 = vmatprep.subr.bf16.mxu0 %v1652_v47  ;;  %v419_v50 = vpop.permute.xlu0 %418 }
 0x13e   : > { %1655 = vmatpush1.bf16.msra.mxu0 %v1654_v48  ;;  %v522_v3 = vld [vmem:[#allocation3 + $0x68] sm:$0xff]  ;;  %v521_v10 = vld [vmem:[#allocation3 + $0x60] sm:$0xff] }
 0x13f   : > { %1657 = vmatprep.subr.bf16.mxu0 %v1656_v52  ;;  %v1664_v9 = vpack.c.bf16 %v1955_v1, %v522_v3  ;;  %v1666_v18 = vpack.c.bf16 %v1955_v1, %v521_v10 }
 0x141   : > { %v450_v55 = vpop.permute.xlu1 %449  ;;  %v452_v59 = vpop.permute.xlu0 %451 }
 0x142   : > { %v453_v61 = vsel %vm342_vm6, %v448_v49, %v450_v55  ;;  %v454_v35 = vsel %vm342_vm6, %v450_v55, %v452_v59  ;;  %1659 = vmatpush1.bf16.msra.mxu0 %v1658_v54  ;;  %v518_v62 = vld [vmem:[#allocation3 + $0x48] sm:$0xff]  ;;  %v517_v63 = vld [vmem:[#allocation3 + $0x40] sm:$0xff] }
 0x143   : > { %457 = vst [vmem:[#allocation3 + $0xc0] sm:$0xf] %v453_v61  ;;  %458 = vst [vmem:[#allocation3 + $0xc8] sm:$0xf] %v454_v35  ;;  %v1660_v4 = vpack.c.bf16 %v1955_v1, %v518_v62  ;;  %v1662_v5 = vpack.c.bf16 %v1955_v1, %v517_v63  ;;  %v507_v62 = vld [vmem:[#allocation4] sm:$0xff] }
 0x145   : > { %v470_v6 = vpop.permute.xlu1 %469  ;;  %1661 = vmatprep.subr.bf16.mxu0 %v1660_v4  ;;  %v421_v7 = vpop.permute.xlu0 %420 }
 0x146   : > { %v424_v11 = vsel %vm373_vm5, %v419_v50, %v421_v7  ;;  %v425_v12 = vsel %vm373_vm5, %v421_v7, %v423_v33  ;;  %1663 = vmatpush1.bf16.msra.mxu0 %v1662_v5 }
 0x147   : > { %428 = vst [vmem:[#allocation3 + $0xa0] sm:$0xf] %v424_v11  ;;  %429 = vst [vmem:[#allocation3 + $0xa8] sm:$0xf] %v425_v12  ;;  %1665 = vmatprep.subr.bf16.mxu0 %v1664_v9 }
 0x149   : > { %v498_v19 = vpop.permute.xlu1 %497  ;;  %v468_v20 = vpop.permute.xlu0 %467 }
 0x14a   : > { %v473_v21 = vsel %vm471_vm11, %v468_v20, %v470_v6  ;;  %1667 = vmatpush1.bf16.msra.mxu0 %v1666_v18  ;;  %v534_v32 = vld [vmem:[#allocation3 + $0xc8] sm:$0xff]  ;;  %v533_v41 = vld [vmem:[#allocation3 + $0xc0] sm:$0xff] }
 0x14b   : > { %477 = vst [vmem:[#allocation3 + $0xe8] sm:$0xf] %v473_v21  ;;  %1669 = vmatprep.subr.bf16.mxu0 %v1668_v51  ;;  %v1676_v40 = vpack.c.bf16 %v1955_v1, %v534_v32  ;;  %v1678_v47 = vpack.c.bf16 %v1955_v1, %v533_v41 }
 0x14d   : > { %v496_v24 = vpop.permute.xlu1 %495  ;;  %v466_v25 = vpop.permute.xlu0 %465 }
 0x14e   : > { %v501_v28 = vsel %vm290_vm4, %v496_v24, %v498_v19  ;;  %v472_v29 = vsel %vm471_vm11, %v466_v25, %v468_v20  ;;  %1671 = vmatpush1.bf16.msra.mxu0 %v1670_v23  ;;  %v530_v30 = vld [vmem:[#allocation3 + $0xa8] sm:$0xff]  ;;  %v529_v31 = vld [vmem:[#allocation3 + $0xa0] sm:$0xff] }
 0x14f   : > { %505 = vst [vmem:[#allocation3 + $0x100] sm:$0xf] %v501_v28  ;;  %476 = vst [vmem:[#allocation3 + $0xe0] sm:$0xf] %v472_v29  ;;  %v1672_v0 = vpack.c.bf16 %v1955_v1, %v530_v30  ;;  %v1674_v33 = vpack.c.bf16 %v1955_v1, %v529_v31 }
 0x151   : > { %v658_v38 = vpop.permute.xlu1 %657  ;;  %1673 = vmatprep.subr.bf16.mxu0 %v1672_v0  ;;  %v500_v39 = vpop.permute.xlu0 %499 }
 0x152   : > { %v502_v43 = vsel %vm290_vm4, %v498_v19, %v500_v39  ;;  %1675 = vmatpush1.bf16.msra.mxu0 %v1674_v33  ;;  %v538_v44 = vld [vmem:[#allocation3 + $0xe8] sm:$0xff] }
 0x153   : > { %506 = vst [vmem:[#allocation3 + $0x108] sm:$0xf] %v502_v43  ;;  %1677 = vmatprep.subr.bf16.mxu0 %v1676_v40  ;;  %v1680_v49 = vpack.c.bf16 %v1955_v1, %v538_v44 }
 0x155   : > { %v654_v48 = vpop.permute.xlu1 %653 }
 0x156   : > { %1679 = vmatpush1.bf16.msra.mxu0 %v1678_v47  ;;  %v537_v50 = vld [vmem:[#allocation3 + $0xe0] sm:$0xff] }
 0x157   : > { %1681 = vmatprep.subr.bf16.mxu0 %v1680_v49  ;;  %v1682_v52 = vpack.c.bf16 %v1955_v1, %v537_v50  ;;  %v541_v54 = vld [vmem:[#allocation3 + $0x100] sm:$0xff] }
 0x158   : > { %v1686_v61 = vpack.c.bf16 %v1955_v1, %v541_v54 }
 0x159   : > { %v694_v27 = vpop.permute.xlu1 %693 }
 0x15a   : > { %1683 = vmatpush1.bf16.msra.mxu0 %v1682_v52  ;;  %v542_v55 = vld [vmem:[#allocation3 + $0x108] sm:$0xff] }
 0x15b   : > { %v1684_v59 = vpack.c.bf16 %v1955_v1, %v542_v55 }
 0x15d   : > { %v690_v35 = vpop.permute.xlu1 %689  ;;  %1685 = vmatprep.subr.bf16.mxu0 %v1684_v59  ;;  %v844_v59 = vld [vmem:[#allocation2 + $0x28] sm:$0xf] }
 0x15e   : > { %1687 = vmatpush1.bf16.msra.mxu0 %v1686_v61 }
 0x161   : > { %v736_v63 = vpop.permute.xlu1 %735  ;;  %619 = vmatmul.mubr.f32.vlgmr.msra.gmra.mrb[0].mxu0 %v507_v62 }
 0x162   : > { %v549_v3 = vpop.permute.xlu0 %548 }
 0x165   : > { %v732_v4 = vpop.permute.xlu1 %731 }
 0x166   : > { %v2315_v5 = vpop.permute.xlu0 %647 }
 0x169   : > { %v778_v36 = vpop.permute.xlu1 %777 }
 0x16a   : > { %v692_v6 = vpop.permute.xlu0 %691 }
 0x16b   : > { %v697_v7 = vsel %vm326_vm7, %v690_v35, %v692_v6  ;;  %v698_v9 = vsel %vm326_vm7, %v692_v6, %v694_v27  ;;  %v850_v35 = vmul.f32 %v2173_v60, %v844_v59 }
 0x16c   : > { %705 = vst [vmem:[#allocation3 + $0x30] sm:$0xf] %v697_v7  ;;  %706 = vst [vmem:[#allocation3 + $0x38] sm:$0xf] %v698_v9  ;;  %v886_v7 = vld [vmem:[#allocation2 + $0x28] sm:$0xf] }
 0x16d   : > { %v774_v10 = vpop.permute.xlu1 %773 }
 0x16e   : > { %v2319_v11 = vpop.permute.xlu0 %683 }
 0x171   : > { %v2321_v12 = vpop.permute.xlu1 %821 }
 0x172   : > { %v2323_v51 = vpop.permute.xlu0 %725 }
 0x175   : > { %v828_v18 = vpop.permute.xlu1 %827 }
 0x176   : > { %v2325_v16 = vpop.permute.xlu0 %767 }
 0x179   : > { %v824_v23 = vpop.permute.xlu1 %823 }
 0x17a   : > { %v656_v19 = vpop.permute.xlu0 %655 }
 0x17b   : > { %v661_v20 = vsel %vm307_vm10, %v654_v48, %v656_v19  ;;  %v662_v21 = vsel %vm307_vm10, %v656_v19, %v658_v38  ;;  %v924_v19 = vld [vmem:[#allocation2 + $0x38] sm:$0xf] }
 0x17c   : > { %669 = vst [vmem:[#allocation3 + $0x10] sm:$0xf] %v661_v20  ;;  %670 = vst [vmem:[#allocation3 + $0x18] sm:$0xf] %v662_v21  ;;  %v930_v21 = vmul.f32 %v2194_v13, %v924_v19 }
 0x17d   : > { %v2333_v32 = vpop.permute.xlu1 %863 }
 0x17e   : > { %v734_v24 = vpop.permute.xlu0 %733 }
 0x17f   : > { %v739_v25 = vsel %vm359_vm8, %v732_v4, %v734_v24  ;;  %v740_v28 = vsel %vm359_vm8, %v734_v24, %v736_v63  ;;  %v887_v4 = vld [vmem:[#allocation2 + $0x30] sm:$0xf] }
 0x180   : > { %747 = vst [vmem:[#allocation3 + $0x50] sm:$0xf] %v739_v25  ;;  %748 = vst [vmem:[#allocation3 + $0x58] sm:$0xf] %v740_v28 }
 0x181   : > { %v870_v39 = vpop.permute.xlu1 %869 }
 0x182   : > { %v776_v29 = vpop.permute.xlu0 %775 }
 0x183   : > { %v781_v30 = vsel %vm390_vm9, %v774_v10, %v776_v29  ;;  %v782_v31 = vsel %vm390_vm9, %v776_v29, %v778_v36  ;;  %v888_v36 = vld [vmem:[#allocation2 + $0x38] sm:$0xf]  ;;  %v2395_v10 = vmul.f32 0.0, %v2194_v13  ;;  %v1641_v13 = vld [vmem:[%s2712_s2 + $0x8] sm:$0xff] }
 0x184   : > { %789 = vst [vmem:[#allocation3 + $0x70] sm:$0xf] %v781_v30  ;;  %790 = vst [vmem:[#allocation3 + $0x78] sm:$0xf] %v782_v31  ;;  %v963_v29 = vld [vmem:[#allocation4 + $0x18] sm:$0xff] }
 0x185   : > { %1642 = vmatprep.mubr.msk.f32.mxu1 %vm326_vm7, %v963_v29 }
 0x186   : > { %v826_v0 = vpop.permute.xlu0 %825 }
 0x187   : > { %v831_v33 = vsel %vm373_vm5, %v824_v23, %v826_v0  ;;  %v832_v38 = vsel %vm373_vm5, %v826_v0, %v828_v18  ;;  %v923_v18 = vld [vmem:[#allocation2 + $0x30] sm:$0xf]  ;;  %v922_v23 = vld [vmem:[#allocation2 + $0x28] sm:$0xf] }
 0x188   : > { %839 = vst [vmem:[#allocation3 + $0xb0] sm:$0xf] %v831_v33  ;;  %840 = vst [vmem:[#allocation3 + $0xb8] sm:$0xf] %v832_v38  ;;  %v929_v20 = vmul.f32 %v923_v18, %v2208_v22  ;;  %v928_v25 = vmul.f32 %v2196_v14, %v922_v23  ;;  %v967_v33 = vld [vmem:[#allocation3 + $0x18] sm:$0xff] }
 0x18a   : > { %v2337_v40 = vpop.permute.xlu0 %867 }
 0x18b   : > { %v874_v41 = vsel %vm342_vm6, %v2337_v40, %v870_v39  ;;  %v966_v39 = vld [vmem:[#allocation3 + $0x10] sm:$0xff] }
 0x18c   : > { %882 = vst [vmem:[#allocation3 + $0xd8] sm:$0xf] %v874_v41  ;;  %v978_v18 = vld [vmem:[#allocation3 + $0x70] sm:$0xff] }
 0x234   : > { %v620_v43 = vpop.f32.mrb[0].mxu0 }
 0x235   : > { %v621_v44 = vadd.f32 %v620_v43, %v549_v3  ;;  %v622_v47 = vpop.f32.mrb[1].mxu0 }
 0x236   : > { %v623_v48 = vadd.f32 %v622_v47, %v549_v3 }
 0x237   : > { %v2341_v49 = vmax.f32 %v621_v44, 0.0  ;;  %v971_v44 = vld [vmem:[#allocation3 + $0x38] sm:$0xff] }
 0x238   : > { %v2343_v50 = vmax.f32 %v623_v48, 0.0 }
 0x239   : > { %685 = vrot.lane.b32.xlu0 %v2341_v49, %s1962_s6  ;;  %1251 = vst [vmem:[#allocation3 + $0x80] sm:$0xff] %v2341_v49  ;;  %v714_v52 = vmul.f32 %v2341_v49, %v2169_v58  ;;  %v636_v27 = vmul.f32 %v2341_v49, %v2147_v42  ;;  %v756_v54 = vmul.f32 %v2341_v49, %v2155_v46 }
 0x23a   : > { %687 = vrot.lane.b32.xlu1 %v2343_v50, %s1962_s6  ;;  %1252 = vst [vmem:[#allocation3 + $0x88] sm:$0xff] %v2343_v50  ;;  %v2361_v55 = vmul.f32 %v2126_v26, %v2343_v50  ;;  %v805_v61 = vmul.f32 %v2164_v56, %v2341_v49  ;;  %v847_v62 = vmul.f32 %v2173_v60, %v2341_v49 }
 0x23b   : > { %v715_v63 = vmul.f32 %v2132_v34, %v2343_v50  ;;  %v757_v3 = vmul.f32 %v2140_v37, %v2343_v50  ;;  %v806_v6 = vmul.f32 %v2343_v50, %v2201_v17  ;;  %v848_v9 = vmul.f32 %v2343_v50, %v2188_v8 }
 0x23c   : > { %v2406_v24 = vmul.f32 %v2343_v50, %v2208_v22  ;;  %v2414_v28 = vmul.f32 %v2196_v14, %v2341_v49 }
 0x23d   : > { %727 = vrot.lane.b32.xlu0 %v714_v52, %s1960_s4 }
 0x23e   : > { %649 = vrot.lane.b32.xlu1 %v636_v27, %s1961_s5 }
 0x241   : > { %769 = vrot.lane.b32.xlu0 %v756_v54, %s1959_s30 }
 0x242   : > { %651 = vrot.lane.b32.xlu1 %v2361_v55, %s1961_s5 }
 0x245   : > { %817 = vrot.lane.b32.xlu0 %v805_v61, %s1957_s28 }
 0x246   : > { %865 = vrot.lane.b32.xlu1 %v850_v35, %s1958_s29 }
 0x249   : > { %859 = vrot.lane.b32.xlu0 %v847_v62, %s1958_s29 }
 0x24a   : > { %729 = vrot.lane.b32.xlu1 %v715_v63, %s1960_s4 }
 0x24d   : > { %897 = vrot.lane.b32.xlu0 %v2343_v50, %s1964_s7 }
 0x24e   : > { %771 = vrot.lane.b32.xlu1 %v757_v3, %s1959_s30 }
 0x251   : > { %903 = vrot.lane.b32.xlu0 %v887_v4, %s1964_s7 }
 0x252   : > { %899 = vrot.lane.b32.xlu1 %v1955_v1, %s1964_s7 }
 0x255   : > { %895 = vrot.lane.b32.xlu0 %v2341_v49, %s1964_s7 }
 0x256   : > { %905 = vrot.lane.b32.xlu1 %v888_v36, %s1964_s7 }
 0x259   : > { %819 = vrot.lane.b32.xlu0 %v806_v6, %s1957_s28 }
 0x25a   : > { %901 = vrot.lane.b32.xlu1 %v886_v7, %s1964_s7  ;;  %v979_v7 = vld [vmem:[#allocation3 + $0x78] sm:$0xff] }
 0x25d   : > { %861 = vrot.lane.b32.xlu0 %v848_v9, %s1958_s29 }
 0x25e   : > { %941 = vrot.lane.b32.xlu1 %v2395_v10, %s1956_s27 }
 0x261   : > { %945 = vrot.lane.b32.xlu0 %v929_v20, %s1956_s27 }
 0x262   : > { %947 = vrot.lane.b32.xlu1 %v930_v21, %s1956_s27 }
 0x265   : > { %939 = vrot.lane.b32.xlu0 %v2406_v24, %s1956_s27 }
 0x266   : > { %943 = vrot.lane.b32.xlu1 %v928_v25, %s1956_s27  ;;  %v982_v25 = vld [vmem:[#allocation3 + $0x90] sm:$0xff] }
 0x269   : > { %937 = vrot.lane.b32.xlu0 %v2414_v28, %s1956_s27 }
 0x26a   : > { %1105 = vrot.lane.b32.xlu1 %v636_v27, %s1961_s5  ;;  %v970_v27 = vld [vmem:[#allocation3 + $0x30] sm:$0xff] }
 0x26d   : > { %1004 = vperm.xlu0 %1852, %v1641_v13  }
 0x26e   : > { %1103 = vrot.lane.b32.xlu1 %v2230_v45, %s1961_s5 }
 0x271   : > { %1109 = vrot.lane.b32.xlu0 %v2230_v45, %s1961_s5 }
 0x272   : > { %1141 = vrot.lane.b32.xlu1 %v2341_v49, %s1962_s6 }
 0x275   : > { %1143 = vrot.lane.b32.xlu0 %v2343_v50, %s1962_s6 }
 0x276   : > { %1139 = vrot.lane.b32.xlu1 %v1955_v1, %s1962_s6 }
 0x279   : > { %1145 = vrot.lane.b32.xlu0 %v1955_v1, %s1962_s6 }
 0x27a   : > { %1183 = vrot.lane.b32.xlu1 %v714_v52, %s1960_s4 }
 0x27d   : > { %1187 = vrot.lane.b32.xlu0 %v2243_v53, %s1960_s4 }
 0x27e   : > { %1181 = vrot.lane.b32.xlu1 %v2243_v53, %s1960_s4 }
 0x281   : > { %1229 = vrot.lane.b32.xlu0 %v2250_v57, %s1959_s30 }
 0x282   : > { %1225 = vrot.lane.b32.xlu1 %v756_v54, %s1959_s30 }
 0x285   : > { %1277 = vrot.lane.b32.xlu0 %v2260_v2, %s1957_s28 }
 0x286   : > { %1223 = vrot.lane.b32.xlu1 %v2250_v57, %s1959_s30 }
 0x289   : > { %1283 = vrot.lane.b32.xlu0 %v2260_v2, %s1957_s28 }
 0x28a   : > { %1273 = vrot.lane.b32.xlu1 %v805_v61, %s1957_s28 }
 0x28d   : > { %1319 = vrot.lane.b32.xlu0 %v2275_v15, %s1958_s29 }
 0x28e   : > { %1315 = vrot.lane.b32.xlu1 %v847_v62, %s1958_s29 }
 0x291   : > { %1325 = vrot.lane.b32.xlu0 %v2275_v15, %s1958_s29 }
 0x292   : > { %1275 = vrot.lane.b32.xlu1 %v806_v6, %s1957_s28 }
 0x295   : > { %1107 = vrot.lane.b32.xlu0 %v2361_v55, %s1961_s5 }
 0x296   : > { %1317 = vrot.lane.b32.xlu1 %v848_v9, %s1958_s29  ;;  %v983_v9 = vld [vmem:[#allocation3 + $0x98] sm:$0xff] }
 0x297   : > { %v1704_v23 = vpack.c.bf16 %v983_v9, %v2343_v50 }
 0x299   : > { %1185 = vrot.lane.b32.xlu0 %v715_v63, %s1960_s4  ;;  %v974_v63 = vld [vmem:[#allocation3 + $0x50] sm:$0xff] }
 0x29d   : > { %1227 = vrot.lane.b32.xlu0 %v757_v3, %s1959_s30 }
 0x2ab   : > { %v686_v1 = vpop.permute.xlu0 %685 }
 0x2ac   : > { %v688_v45 = vpop.permute.xlu1 %687  ;;  %v695_v47 = vsel %vm326_vm7, %v2319_v11, %v686_v1  ;;  %v975_v11 = vld [vmem:[#allocation3 + $0x58] sm:$0xff] }
 0x2ad   : > { %v696_v31 = vsel %vm326_vm7, %v686_v1, %v688_v45  ;;  %v1694_v55 = vpack.c.bf16 %v970_v27, %v695_v47 }
 0x2ae   : > { %v1692_v52 = vpack.c.bf16 %v971_v44, %v696_v31 }
 0x2af   : > { %v728_v53 = vpop.permute.xlu0 %727 }
 0x2b0   : > { %v650_v57 = vpop.permute.xlu1 %649  ;;  %v737_v59 = vsel %vm359_vm8, %v2323_v51, %v728_v53 }
 0x2b1   : > { %v659_v30 = vsel %vm307_vm10, %v2315_v5, %v650_v57  ;;  %v1698_v4 = vpack.c.bf16 %v974_v63, %v737_v59 }
 0x2b2   : > { %v1690_v43 = vpack.c.bf16 %v966_v39, %v659_v30  ;;  %v987_v30 = vld [vmem:[#allocation3 + $0xb8] sm:$0xff] }
 0x2b3   : > { %v770_v2 = vpop.permute.xlu0 %769 }
 0x2b4   : > { %v652_v15 = vpop.permute.xlu1 %651 }
 0x2b5   : > { %v660_v0 = vsel %vm307_vm10, %v650_v57, %v652_v15  ;;  %v986_v15 = vld [vmem:[#allocation3 + $0xb0] sm:$0xff] }
 0x2b6   : > { %v1688_v38 = vpack.c.bf16 %v967_v33, %v660_v0 }
 0x2b7   : > { %v818_v41 = vpop.permute.xlu0 %817 }
 0x2b8   : > { %v866_v48 = vpop.permute.xlu1 %865  ;;  %1689 = vmatprep.subr.bf16.mxu1 %v1688_v38 }
 0x2b9   : > { %v873_v5 = vsel %vm342_vm6, %v866_v48, %v2337_v40  ;;  %1691 = vmatpush1.bf16.msra.mxu1 %v1690_v43  ;;  %v779_v40 = vsel %vm390_vm9, %v2325_v16, %v770_v2  ;;  %v1706_v16 = vpack.c.bf16 %v982_v25, %v2341_v49 }
 0x2ba   : > { %881 = vst [vmem:[#allocation3 + $0xd0] sm:$0xf] %v873_v5  ;;  %1693 = vmatprep.subr.bf16.mxu1 %v1692_v52  ;;  %v1702_v20 = vpack.c.bf16 %v978_v18, %v779_v40 }
 0x2bb   : > { %v860_v54 = vpop.permute.xlu0 %859 }
 0x2bc   : > { %v730_v61 = vpop.permute.xlu1 %729 }
 0x2bd   : > { %v738_v35 = vsel %vm359_vm8, %v728_v53, %v730_v61  ;;  %1695 = vmatpush1.bf16.msra.mxu1 %v1694_v55 }
 0x2be   : > { %v1696_v62 = vpack.c.bf16 %v975_v11, %v738_v35 }
 0x2bf   : > { %v898_v3 = vpop.permute.xlu0 %897 }
 0x2c0   : > { %v772_v36 = vpop.permute.xlu1 %771  ;;  %1697 = vmatprep.subr.bf16.mxu1 %v1696_v62 }
 0x2c1   : > { %v780_v6 = vsel %vm390_vm9, %v770_v2, %v772_v36  ;;  %1699 = vmatpush1.bf16.msra.mxu1 %v1698_v4  ;;  %v990_v47 = vld [vmem:[#allocation3 + $0xd0] sm:$0xff] }
 0x2c2   : > { %v1700_v51 = vpack.c.bf16 %v979_v7, %v780_v6 }
 0x2c3   : > { %v904_v19 = vpop.permute.xlu0 %903 }
 0x2c4   : > { %v900_v21 = vpop.permute.xlu1 %899  ;;  %1701 = vmatprep.subr.bf16.mxu1 %v1700_v51 }
 0x2c5   : > { %1703 = vmatpush1.bf16.msra.mxu1 %v1702_v20 }
 0x2c6   : > { %1705 = vmatprep.subr.bf16.mxu1 %v1704_v23 }
 0x2c7   : > { %v896_v13 = vpop.permute.xlu0 %895 }
 0x2c8   : > { %v906_v29 = vpop.permute.xlu1 %905  ;;  %v907_v61 = vsel %vm471_vm11, %v896_v13, %v898_v3 }
 0x2c9   : > { %v910_v1 = vsel %vm471_vm11, %v904_v19, %v906_v29  ;;  %1707 = vmatpush1.bf16.msra.mxu1 %v1706_v16 }
 0x2ca   : > { %918 = vst [vmem:[#allocation3 + $0xf8] sm:$0xf] %v910_v1 }
 0x2cb   : > { %v820_v45 = vpop.permute.xlu0 %819 }
 0x2cc   : > { %v829_v53 = vsel %vm373_vm5, %v818_v41, %v820_v45  ;;  %v830_v57 = vsel %vm373_vm5, %v820_v45, %v2321_v12  ;;  %v902_v2 = vpop.permute.xlu1 %901  ;;  %v991_v41 = vld [vmem:[#allocation3 + $0xd8] sm:$0xff]  ;;  %v908_v12 = vsel %vm471_vm11, %v898_v3, %v900_v21  ;;  %v962_v21 = vld [vmem:[#allocation4 + $0x10] sm:$0xff] }
 0x2cd   : > { %v909_v31 = vsel %vm471_vm11, %v902_v2, %v904_v19  ;;  %v1708_v0 = vpack.c.bf16 %v987_v30, %v830_v57  ;;  %v1710_v33 = vpack.c.bf16 %v986_v15, %v829_v53 }
 0x2ce   : > { %917 = vst [vmem:[#allocation3 + $0xf0] sm:$0xf] %v909_v31 }
 0x2cf   : > { %v862_v38 = vpop.permute.xlu0 %861  ;;  %1709 = vmatprep.subr.bf16.mxu1 %v1708_v0 }
 0x2d0   : > { %v871_v39 = vsel %vm342_vm6, %v860_v54, %v862_v38  ;;  %v872_v43 = vsel %vm342_vm6, %v862_v38, %v2333_v32  ;;  %v942_v44 = vpop.permute.xlu1 %941  ;;  %1711 = vmatpush1.bf16.msra.mxu1 %v1710_v33 }
 0x2d1   : > { %v1712_v48 = vpack.c.bf16 %v991_v41, %v872_v43  ;;  %v1714_v52 = vpack.c.bf16 %v990_v47, %v871_v39  ;;  %v995_v5 = vld [vmem:[#allocation3 + $0xf8] sm:$0xff] }
 0x2d2   : > { %v1716_v27 = vpack.c.bf16 %v995_v5, %v908_v12 }
 0x2d3   : > { %v946_v55 = vpop.permute.xlu0 %945  ;;  %1713 = vmatprep.subr.bf16.mxu1 %v1712_v48 }
 0x2d4   : > { %v948_v59 = vpop.permute.xlu1 %947  ;;  %1715 = vmatpush1.bf16.msra.mxu1 %v1714_v52 }
 0x2d5   : > { %v952_v54 = vsel %vm290_vm4, %v946_v55, %v948_v59  ;;  %1717 = vmatprep.subr.bf16.mxu1 %v1716_v27  ;;  %v994_v32 = vld [vmem:[#allocation3 + $0xf0] sm:$0xff] }
 0x2d6   : > { %960 = vst [vmem:[#allocation3 + $0x118] sm:$0xf] %v952_v54  ;;  %v1718_v35 = vpack.c.bf16 %v994_v32, %v907_v61 }
 0x2d7   : > { %v940_v11 = vpop.permute.xlu0 %939 }
 0x2d8   : > { %v944_v62 = vpop.permute.xlu1 %943  ;;  %1719 = vmatpush1.bf16.msra.mxu1 %v1718_v35  ;;  %v950_v40 = vsel %vm290_vm4, %v940_v11, %v942_v44 }
 0x2d9   : > { %v951_v63 = vsel %vm290_vm4, %v944_v62, %v946_v55 }
 0x2da   : > { %959 = vst [vmem:[#allocation3 + $0x110] sm:$0xf] %v951_v63 }
 0x2db   : > { %v938_v6 = vpop.permute.xlu0 %937 }
 0x2dc   : > { %v1106_v4 = vpop.permute.xlu1 %1105  ;;  %v949_v3 = vsel %vm290_vm4, %v938_v6, %v940_v11 }
 0x2dd   : > { %v999_v36 = vld [vmem:[#allocation3 + $0x118] sm:$0xff] }
 0x2de   : > { %v1720_v7 = vpack.c.bf16 %v999_v36, %v950_v40 }
 0x2e0   : > { %v1104_v9 = vpop.permute.xlu1 %1103  ;;  %1721 = vmatprep.subr.bf16.mxu1 %v1720_v7 }
 0x2e1   : > { %v2492_v51 = vsel %vm307_vm10, %v1104_v9, %v1106_v4  ;;  %v998_v18 = vld [vmem:[#allocation3 + $0x110] sm:$0xff] }
 0x2e2   : > { %1123 = vst [vmem:[#allocation3] sm:$0xff] %v2492_v51  ;;  %v1722_v19 = vpack.c.bf16 %v998_v18, %v949_v3 }
 0x2e4   : > { %v1142_v20 = vpop.permute.xlu1 %1141  ;;  %1723 = vmatpush1.bf16.msra.mxu1 %v1722_v19 }
 0x2e7   : > { %1075 = vmatmul.mubr.f32.vlgmr.msra.gmra.mrb[0].mxu1 %v962_v21 }
 0x2e8   : > { %v1140_v23 = vpop.permute.xlu1 %1139 }
 0x2e9   : > { %v2496_v25 = vsel %vm326_vm7, %v1140_v23, %v1142_v20 }
 0x2ea   : > { %1159 = vst [vmem:[#allocation3 + $0x20] sm:$0xff] %v2496_v25 }
 0x2ec   : > { %v1184_v13 = vpop.permute.xlu1 %1183  ;;  %v1005_v16 = vpop.permute.xlu0 %1004 }
 0x2f0   : > { %v1182_v29 = vpop.permute.xlu1 %1181  ;;  %v2499_v1 = vpop.permute.xlu0 %1109 }
 0x2f1   : > { %v2502_v45 = vsel %vm359_vm8, %v1182_v29, %v1184_v13 }
 0x2f2   : > { %1201 = vst [vmem:[#allocation3 + $0x40] sm:$0xff] %v2502_v45 }
 0x2f4   : > { %v1226_v53 = vpop.permute.xlu1 %1225  ;;  %v1144_v57 = vpop.permute.xlu0 %1143 }
 0x2f5   : > { %v2506_v2 = vsel %vm326_vm7, %v1142_v20, %v1144_v57 }
 0x2f6   : > { %1160 = vst [vmem:[#allocation3 + $0x28] sm:$0xff] %v2506_v2 }
 0x2f8   : > { %v1224_v30 = vpop.permute.xlu1 %1223  ;;  %v2509_v15 = vpop.permute.xlu0 %1145 }
 0x2f9   : > { %v2512_v31 = vsel %vm390_vm9, %v1224_v30, %v1226_v53 }
 0x2fa   : > { %1243 = vst [vmem:[#allocation3 + $0x60] sm:$0xff] %v2512_v31 }
 0x2fc   : > { %v1274_v0 = vpop.permute.xlu1 %1273  ;;  %v2515_v33 = vpop.permute.xlu0 %1187 }
 0x300   : > { %v1316_v38 = vpop.permute.xlu1 %1315  ;;  %v2517_v39 = vpop.permute.xlu0 %1229 }
 0x304   : > { %v1276_v43 = vpop.permute.xlu1 %1275  ;;  %v1278_v44 = vpop.permute.xlu0 %1277 }
 0x305   : > { %v2520_v41 = vsel %vm373_vm5, %v1274_v0, %v1276_v43  ;;  %v2523_v47 = vsel %vm373_vm5, %v1276_v43, %v1278_v44 }
 0x306   : > { %1293 = vst [vmem:[#allocation3 + $0xa0] sm:$0xff] %v2520_v41  ;;  %1294 = vst [vmem:[#allocation3 + $0xa8] sm:$0xff] %v2523_v47 }
 0x308   : > { %v1318_v12 = vpop.permute.xlu1 %1317  ;;  %v2527_v48 = vpop.permute.xlu0 %1283 }
 0x309   : > { %v2530_v52 = vsel %vm342_vm6, %v1316_v38, %v1318_v12 }
 0x30a   : > { %1335 = vst [vmem:[#allocation3 + $0xc0] sm:$0xff] %v2530_v52 }
 0x30c   : > { %v1320_v5 = vpop.permute.xlu0 %1319 }
 0x30d   : > { %v2534_v27 = vsel %vm342_vm6, %v1318_v12, %v1320_v5 }
 0x30e   : > { %1336 = vst [vmem:[#allocation3 + $0xc8] sm:$0xff] %v2534_v27 }
 0x310   : > { %v2537_v55 = vpop.permute.xlu0 %1325 }
 0x314   : > { %v1108_v59 = vpop.permute.xlu0 %1107 }
 0x315   : > { %v2540_v61 = vsel %vm307_vm10, %v1106_v4, %v1108_v59 }
 0x316   : > { %1124 = vst [vmem:[#allocation3 + $0x8] sm:$0xff] %v2540_v61 }
 0x318   : > { %v1186_v54 = vpop.permute.xlu0 %1185 }
 0x319   : > { %v2544_v32 = vsel %vm359_vm8, %v1184_v13, %v1186_v54 }
 0x31a   : > { %1202 = vst [vmem:[#allocation3 + $0x48] sm:$0xff] %v2544_v32 }
 0x31c   : > { %v1228_v35 = vpop.permute.xlu0 %1227 }
 0x31d   : > { %v2548_v11 = vsel %vm390_vm9, %v1226_v53, %v1228_v35 }
 0x31e   : > { %1244 = vst [vmem:[#allocation3 + $0x68] sm:$0xff] %v2548_v11 }
 0x3ba   : > { %v1076_v62 = vpop.f32.mrb[0].mxu1 }
 0x3bb   : > { %v1077_v63 = vadd.f32 %v1076_v62, %v1005_v16  ;;  %v1078_v40 = vpop.f32.mrb[1].mxu1 }
 0x3bc   : > { %v1079_v36 = vadd.f32 %v1078_v40, %v1005_v16 }
 0x3bd   : > { %v2551_v4 = vmax.f32 %v1077_v63, 0.0 }
 0x3be   : > { %v2553_v6 = vmax.f32 %v1079_v36, 0.0 }
 0x3bf   : > { %1083 = vst [vmem:[#allocation2 + $0x28] sm:$0xff] %v2551_v4  ;;  %1147 = vrot.lane.b32.xlu1 %v2551_v4, %s1962_s6  ;;  %1253 = vst [vmem:[#allocation3 + $0x90] sm:$0xff] %v2551_v4  ;;  %v1095_v7 = vmul.f32 %v2551_v4, %v2147_v42  ;;  %v1264_v9 = vmul.f32 %v2164_v56, %v2551_v4  ;;  %v1173_v3 = vmul.f32 %v2551_v4, %v2169_v58 }
 0x3c0   : > { %1084 = vst [vmem:[#allocation2 + $0x30] sm:$0xff] %v2553_v6  ;;  %1149 = vrot.lane.b32.xlu0 %v2553_v6, %s1962_s6  ;;  %1254 = vst [vmem:[#allocation3 + $0x98] sm:$0xff] %v2553_v6  ;;  %v1096_v18 = vmul.f32 %v2126_v26, %v2553_v6  ;;  %v1215_v42 = vmul.f32 %v2551_v4, %v2155_v46  ;;  %v1306_v56 = vmul.f32 %v2173_v60, %v2551_v4  ;;  %v1855_v46 = vld [vmem:[#allocation2] sm:$0xff]  ;;  %v1419_v60 = vld [vmem:[#allocation4 + $0x28] sm:$0xff]  ;;  %s1888_s6 = sshll.u32 %s1965_s16, 4  ;;  %s1889_s6 = int_to_ptr.vmem [resolvable:$false] %s1888_s6 }
 0x3c1   : > { %v1174_v58 = vmul.f32 %v2132_v34, %v2553_v6  ;;  %v1216_v26 = vmul.f32 %v2140_v37, %v2553_v6  ;;  %v1265_v34 = vmul.f32 %v2553_v6, %v2201_v17  ;;  %v1307_v37 = vmul.f32 %v2553_v6, %v2188_v8  ;;  %1644 = vmatprep.mubr.msk.f32.mxu0 %vm326_vm7, %v1419_v60 }
 0x3c2   : > { %v1385_v17 = vmul.f32 %v2553_v6, %v2208_v22  ;;  %v1384_v8 = vmul.f32 %v2196_v14, %v2551_v4 }
 0x3c3   : > { %1111 = vrot.lane.b32.xlu1 %v1095_v7, %s1961_s5 }
 0x3c4   : > { %1279 = vrot.lane.b32.xlu0 %v1264_v9, %s1957_s28 }
 0x3c7   : > { %1189 = vrot.lane.b32.xlu1 %v1173_v3, %s1960_s4 }
 0x3c8   : > { %1113 = vrot.lane.b32.xlu0 %v1096_v18, %s1961_s5 }
 0x3cb   : > { %1231 = vrot.lane.b32.xlu1 %v1215_v42, %s1959_s30 }
 0x3cc   : > { %1321 = vrot.lane.b32.xlu0 %v1306_v56, %s1958_s29 }
 0x3cf   : > { %1353 = vrot.lane.b32.xlu1 %v2343_v50, %s1964_s7 }
 0x3d0   : > { %1191 = vrot.lane.b32.xlu0 %v1174_v58, %s1960_s4  ;;  %s1542_s4 = scalar_lea.sflag [#allocation6], %s176_s20 }
 0x3d3   : > { %1359 = vrot.lane.b32.xlu1 %v2553_v6, %s1964_s7 }
 0x3d4   : > { %1233 = vrot.lane.b32.xlu0 %v1216_v26, %s1959_s30  ;;  %s2668_s30 = scalar_lea.hbm %s2713_s3, %s1651_s25 }
 0x3d7   : > { %1351 = vrot.lane.b32.xlu1 %v2341_v49, %s1964_s7 }
 0x3d8   : > { %1355 = vrot.lane.b32.xlu0 %v1855_v46, %s1964_s7 }
 0x3db   : > { %1281 = vrot.lane.b32.xlu1 %v1265_v34, %s1957_s28 }
 0x3dc   : > { %1361 = vrot.lane.b32.xlu0 %v1855_v46, %s1964_s7 }
 0x3df   : > { %1323 = vrot.lane.b32.xlu1 %v1307_v37, %s1958_s29 }
 0x3e0   : > { %1357 = vrot.lane.b32.xlu0 %v2551_v4, %s1964_s7  ;;  %s1890_s7 = scalar_lea.vmem %s1889_s6, 512 }
 0x3e3   : > { %1395 = vrot.lane.b32.xlu1 %v2406_v24, %s1956_s27  ;;  %v1643_v24 = vld [vmem:[%s2712_s2 + $0x10] sm:$0xff] }
 0x3e4   : > { %1397 = vrot.lane.b32.xlu0 %v2395_v10, %s1956_s27 }
 0x3e7   : > { %1401 = vrot.lane.b32.xlu1 %v1385_v17, %s1956_s27 }
 0x3e8   : > { %1403 = vrot.lane.b32.xlu0 %v2395_v10, %s1956_s27 }
 0x3eb   : > { %1393 = vrot.lane.b32.xlu1 %v2414_v28, %s1956_s27 }
 0x3ec   : > { %1399 = vrot.lane.b32.xlu0 %v1384_v8, %s1956_s27  ;;  %v1418_v8 = vld [vmem:[#allocation4 + $0x20] sm:$0xff]  ;;  %s1556_s27 = sshll.u32 %s178_s26, 4  ;;  %s2670_s27 = int_to_ptr.vmem [resolvable:$true] %s1556_s27 }
 0x3ed   : > { %s1884_s5 = scalar_lea.vmem %s2670_s27, 256  ;;  %p1891_p2 = scmp.lt.s32.totalorder %s2670_s27, %s1889_s6 }
 0x3ee   : > { %p1885_p6 = scmp.ne.s32.totalorder %s2670_s27, %s1884_s5  ;;  %p1892_p3 = scmp.lt.s32.totalorder %s1890_s7, %s1884_s5 }
 0x3ef   : > { %1460 = vperm.xlu1 %1853, %v1643_v24  }
 0x3f0   : > { %p1886_p10 = pnand %p1885_p6, %p2724_p9  ;;  %p1893_p4 = por %p1892_p3, %p1891_p2 }
 0x3f2   : > { %p1887_p12 = pneg %p1886_p10 }
 0x3f4   : > { %p1894_p7 = pnand %p1893_p4, %p1887_p12 }
 0x431   : > { %v1148_v19 = vpop.permute.xlu1 %1147 }
 0x432   : > { %v1153_v22 = vsel %vm326_vm7, %v2509_v15, %v1148_v19  ;;  %v1150_v20 = vpop.permute.xlu0 %1149 }
 0x433   : > { %1161 = vst [vmem:[#allocation3 + $0x30] sm:$0xff] %v1153_v22  ;;  %v1154_v10 = vsel %vm326_vm7, %v1148_v19, %v1150_v20  ;;  %v1730_v38 = vpack.c.bf16 %v1153_v22, %v2496_v25 }
 0x434   : > { %1162 = vst [vmem:[#allocation3 + $0x38] sm:$0xff] %v1154_v10  ;;  %v1728_v0 = vpack.c.bf16 %v1154_v10, %v2506_v2 }
 0x435   : > { %v1112_v14 = vpop.permute.xlu1 %1111 }
 0x436   : > { %v1117_v28 = vsel %vm307_vm10, %v2499_v1, %v1112_v14  ;;  %v1280_v21 = vpop.permute.xlu0 %1279 }
 0x437   : > { %1125 = vst [vmem:[#allocation3 + $0x10] sm:$0xff] %v1117_v28  ;;  %v1726_v30 = vpack.c.bf16 %v1117_v28, %v2492_v51 }
 0x439   : > { %v1190_v23 = vpop.permute.xlu1 %1189 }
 0x43a   : > { %v1195_v13 = vsel %vm359_vm8, %v2515_v33, %v1190_v23  ;;  %v1114_v16 = vpop.permute.xlu0 %1113 }
 0x43b   : > { %1203 = vst [vmem:[#allocation3 + $0x50] sm:$0xff] %v1195_v13  ;;  %v1118_v29 = vsel %vm307_vm10, %v1112_v14, %v1114_v16 }
 0x43c   : > { %1126 = vst [vmem:[#allocation3 + $0x18] sm:$0xff] %v1118_v29  ;;  %v1724_v53 = vpack.c.bf16 %v1118_v29, %v2540_v61 }
 0x43d   : > { %v1232_v57 = vpop.permute.xlu1 %1231 }
 0x43e   : > { %v1237_v15 = vsel %vm390_vm9, %v2517_v39, %v1232_v57  ;;  %v1322_v1 = vpop.permute.xlu0 %1321  ;;  %1725 = vmatprep.subr.bf16.mxu0 %v1724_v53  ;;  %v1734_v39 = vpack.c.bf16 %v1195_v13, %v2502_v45 }
 0x43f   : > { %1245 = vst [vmem:[#allocation3 + $0x70] sm:$0xff] %v1237_v15  ;;  %1727 = vmatpush1.bf16.msra.mxu0 %v1726_v30  ;;  %v1738_v25 = vpack.c.bf16 %v1237_v15, %v2512_v31 }
 0x440   : > { %1729 = vmatprep.subr.bf16.mxu0 %v1728_v0 }
 0x441   : > { %v1354_v33 = vpop.permute.xlu1 %1353 }
 0x442   : > { %v1192_v43 = vpop.permute.xlu0 %1191 }
 0x443   : > { %v1196_v44 = vsel %vm359_vm8, %v1190_v23, %v1192_v43  ;;  %1731 = vmatpush1.bf16.msra.mxu0 %v1730_v38 }
 0x444   : > { %1204 = vst [vmem:[#allocation3 + $0x58] sm:$0xff] %v1196_v44  ;;  %v1732_v51 = vpack.c.bf16 %v1196_v44, %v2544_v32  ;;  %v1740_v32 = vpack.c.bf16 %v2553_v6, %v2343_v50 }
 0x445   : > { %v1360_v12 = vpop.permute.xlu1 %1359 }
 0x446   : > { %v1234_v5 = vpop.permute.xlu0 %1233  ;;  %1733 = vmatprep.subr.bf16.mxu0 %v1732_v51 }
 0x447   : > { %v1238_v2 = vsel %vm390_vm9, %v1232_v57, %v1234_v5  ;;  %1735 = vmatpush1.bf16.msra.mxu0 %v1734_v39 }
 0x448   : > { %1246 = vst [vmem:[#allocation3 + $0x78] sm:$0xff] %v1238_v2  ;;  %v1736_v59 = vpack.c.bf16 %v1238_v2, %v2548_v11  ;;  %v1742_v11 = vpack.c.bf16 %v2551_v4, %v2341_v49 }
 0x449   : > { %v1352_v61 = vpop.permute.xlu1 %1351 }
 0x44a   : > { %v1363_v54 = vsel %vm471_vm11, %v1352_v61, %v1354_v33  ;;  %v1356_v35 = vpop.permute.xlu0 %1355  ;;  %1737 = vmatprep.subr.bf16.mxu0 %v1736_v59 }
 0x44b   : > { %1371 = vst [vmem:[#allocation3 + $0xe0] sm:$0xff] %v1363_v54  ;;  %v1364_v45 = vsel %vm471_vm11, %v1354_v33, %v1356_v35  ;;  %1739 = vmatpush1.bf16.msra.mxu0 %v1738_v25 }
 0x44c   : > { %1372 = vst [vmem:[#allocation3 + $0xe8] sm:$0xff] %v1364_v45  ;;  %1741 = vmatprep.subr.bf16.mxu0 %v1740_v32 }
 0x44d   : > { %v1282_v62 = vpop.permute.xlu1 %1281 }
 0x44e   : > { %v1287_v63 = vsel %vm373_vm5, %v1280_v21, %v1282_v62  ;;  %v1288_v31 = vsel %vm373_vm5, %v1282_v62, %v2527_v48  ;;  %v1362_v40 = vpop.permute.xlu0 %1361 }
 0x44f   : > { %1295 = vst [vmem:[#allocation3 + $0xb0] sm:$0xff] %v1287_v63  ;;  %1296 = vst [vmem:[#allocation3 + $0xb8] sm:$0xff] %v1288_v31  ;;  %v1366_v50 = vsel %vm471_vm11, %v1360_v12, %v1362_v40  ;;  %1743 = vmatpush1.bf16.msra.mxu0 %v1742_v11  ;;  %v1744_v36 = vpack.c.bf16 %v1288_v31, %v2523_v47  ;;  %v1746_v7 = vpack.c.bf16 %v1287_v63, %v2520_v41 }
 0x450   : > { %1374 = vst [vmem:[#allocation3 + $0xf8] sm:$0xff] %v1366_v50  ;;  %v1752_v41 = vpack.c.bf16 %v1366_v50, %v1364_v45 }
 0x451   : > { %v1324_v6 = vpop.permute.xlu1 %1323  ;;  %1745 = vmatprep.subr.bf16.mxu0 %v1744_v36 }
 0x452   : > { %v1329_v49 = vsel %vm342_vm6, %v1322_v1, %v1324_v6  ;;  %v1330_v4 = vsel %vm342_vm6, %v1324_v6, %v2537_v55  ;;  %v1358_v9 = vpop.permute.xlu0 %1357 }
 0x453   : > { %1337 = vst [vmem:[#allocation3 + $0xd0] sm:$0xff] %v1329_v49  ;;  %1338 = vst [vmem:[#allocation3 + $0xd8] sm:$0xff] %v1330_v4  ;;  %v1365_v48 = vsel %vm471_vm11, %v1358_v9, %v1360_v12  ;;  %1747 = vmatpush1.bf16.msra.mxu0 %v1746_v7  ;;  %v1748_v3 = vpack.c.bf16 %v1330_v4, %v2534_v27  ;;  %v1750_v18 = vpack.c.bf16 %v1329_v49, %v2530_v52 }
 0x454   : > { %1373 = vst [vmem:[#allocation3 + $0xf0] sm:$0xff] %v1365_v48  ;;  %v1754_v58 = vpack.c.bf16 %v1365_v48, %v1363_v54 }
 0x455   : > { %v1396_v47 = vpop.permute.xlu1 %1395  ;;  %1749 = vmatprep.subr.bf16.mxu0 %v1748_v3 }
 0x456   : > { %v1398_v42 = vpop.permute.xlu0 %1397 }
 0x457   : > { %v1406_v56 = vsel %vm290_vm4, %v1396_v47, %v1398_v42  ;;  %1751 = vmatpush1.bf16.msra.mxu0 %v1750_v18 }
 0x458   : > { %1414 = vst [vmem:[#allocation3 + $0x108] sm:$0xff] %v1406_v56  ;;  %1753 = vmatprep.subr.bf16.mxu0 %v1752_v41 }
 0x459   : > { %v1402_v55 = vpop.permute.xlu1 %1401 }
 0x45a   : > { %v1404_v26 = vpop.permute.xlu0 %1403 }
 0x45b   : > { %v1408_v46 = vsel %vm290_vm4, %v1402_v55, %v1404_v26  ;;  %1755 = vmatpush1.bf16.msra.mxu0 %v1754_v58 }
 0x45c   : > { %1416 = vst [vmem:[#allocation3 + $0x118] sm:$0xff] %v1408_v46  ;;  %v1756_v27 = vpack.c.bf16 %v1408_v46, %v1406_v56 }
 0x45d   : > { %v1394_v34 = vpop.permute.xlu1 %1393 }
 0x45e   : > { %v1405_v37 = vsel %vm290_vm4, %v1394_v34, %v1396_v47  ;;  %v1400_v52 = vpop.permute.xlu0 %1399  ;;  %1757 = vmatprep.subr.bf16.mxu0 %v1756_v27 }
 0x45f   : > { %1413 = vst [vmem:[#allocation3 + $0x100] sm:$0xff] %v1405_v37  ;;  %v1407_v60 = vsel %vm290_vm4, %v1400_v52, %v1402_v55 }
 0x460   : > { %1415 = vst [vmem:[#allocation3 + $0x110] sm:$0xff] %v1407_v60  ;;  %v1758_v17 = vpack.c.bf16 %v1407_v60, %v1405_v37 }
 0x462   : > { %1759 = vmatpush1.bf16.msra.mxu0 %v1758_v17 }
 0x465   : > { %1531 = vmatmul.mubr.f32.vlgmr.msra.gmra.mrb[2].mxu0 %v1418_v8 }
 0x46e   : > { %v1461_v24 = vpop.permute.xlu1 %1460 }
 0x538   : > { %v1532_v19 = vpop.f32.mrb[2].mxu0 }
 0x539   : > { %v1533_v22 = vadd.f32 %v1532_v19, %v1461_v24  ;;  %v1534_v20 = vpop.f32.mrb[3].mxu0 }
 0x53a   : > { %v1535_v10 = vadd.f32 %v1534_v20, %v1461_v24 }
 0x53b   : > { %v1537_v14 = vmax.f32 %v1533_v22, 0.0 }
 0x53c   : > { %v1538_v28 = vmax.f32 %v1535_v10, 0.0 }
 0x53d   : > { %1539 = vst [vmem:[%s178_s26] sm:$0xff] %v1537_v14 }
 0x53e   : > { %1540 = vst [vmem:[%s178_s26 + $0x8] sm:$0xff] %v1538_v28 }
 0x53f   : > { %1897 = shalt.err (!%p1894_p7)
}
 0x540   : > { %s1898_s8 = scalar_lea.hbm %s2668_s30, 256  ;;  %s1902_s11 = scalar_lea.hbm %s2713_s3, 512 }
 0x541   : > { %p1899_p8 = scmp.ne.s32.totalorder %s2668_s30, %s1898_s8  ;;  %p1903_p0 = scmp.lt.u32.totalorder %s2668_s30, %s2713_s3 }
 0x542   : > { %p1904_p1 = scmp.lt.u32.totalorder %s1902_s11, %s1898_s8  ;;  %p1906_p6 = scmp.lt.u32.totalorder %s1898_s8, %s2668_s30 }
 0x543   : > { %p1900_p11 = pnand %p1899_p8, %p2724_p9 }
 0x544   : > { %p1905_p5 = por %p1904_p1, %p1903_p0 }
 0x545   : > { %p1901_p13 = pneg %p1900_p11 }
 0x546   : > { %p1907_p10 = por %p1906_p6, %p1905_p5 }
 0x548   : > { %p1908_p12 = pnand %p1907_p10, %p1901_p13 }
 0x54a   : > { %1911 = shalt.err (!%p1908_p12)
}
 0x54b   : > { %1764 = dma.vmem_to_hbm [thread:$0]  (%p2724_p9), %s2670_s27, 256, %s2668_s30, %s1542_s4  }
 0x54c PF: > { %p1776_p2 = scmp.ge.s32.totalorder %s1950_s15, 2  ;;  %s1568_s20 = sand.u32 1, %s1938_s12  }
 0x54d   : > { %p2725_p3 = scmp.ne.s32.totalorder %s2718_s23, 0  ;;  %s1569_s24 = scalar_lea.sflag [#allocation6], %s1568_s20 }
 0x54f   : > { %p1771_p4 = pnand %p1776_p2, %p2725_p3 }
 0x551   : > { %1933 = dma.done.wait (!%p1771_p4), %s1569_s24, 256  }
 0x552   : > { %1935 = vsyncadd (!%p1771_p4), %s1569_s24, 4294967040  ;;  %p14_p7 = scmp.ge.s32.totalorder %s2011_s18, 4   ;;  %s2726_s12 = smov %s1942_s13 }
 0x553   : > { %s2727_s13 = smov %s1946_s14  ;;  %s2728_s14 = smov %s2022_s21 }
 0x554   : > { %s2729_s15 = smov %s2011_s18  ;;  %16 = sbr.rel (!%p14_p7) target bundleno = 4 (0x4), region = 76 }
 0x55b   :  { %1574 = vsyncpa [#allocation5], 1 }
 0x55c   :  { %1576 = vsyncpa [#allocation5 + $0x1], 1 }
 0x55d   :  { %1577 = vsyncpa [#allocation6], 1 }
 0x55e   :  { %1579 = vsyncpa [#allocation6 + $0x1], 1 }

</bundles_post_ra>
